<compile_context>
chip_gen: v7x
topology: tpu7x:2x2x1
jax: 0.10.0
libtpu: 0.0.40
codegen_flags: <defaults>
</compile_context>

<pallas_src>
import functools

import jax
import jax.numpy as jnp
from jax import lax
from jax.experimental import pallas as pl
from jax.experimental.pallas import tpu as pltpu


def _conv3x3_bias_prelu_kernel(x_ref, w_ref, b_ref, a_ref, o_ref, patch_ref,
                               *, th, wd, cin, cout):
    """One (batch, row-tile) grid step of Conv2d(3x3, pad=1) + bias + PReLU.

    x_ref:     (th+2, wd+2, cin)  bf16  padded input row tile (1-row/col halo)
    w_ref:     (9*cin, cout)      bf16  conv weight, rows ordered (ky, kx, cin)
    b_ref:     (1, cout)          f32   conv bias
    a_ref:     (1,)               f32   PReLU alpha (single shared parameter), SMEM
    o_ref:     (th, wd, cout)     f32   conv + bias + PReLU output (pre pixel-shuffle)
    patch_ref: (th, wd, 9*cin)    bf16  VMEM scratch: in-VMEM im2col patch
    """
    # In-VMEM im2col: pack the 9 statically shifted halo slices along channels.
    for ky in range(3):
        for kx in range(3):
            off = (3 * ky + kx) * cin
            patch_ref[:, :, off:off + cin] = x_ref[ky:ky + th, kx:kx + wd, :]

    # Single MXU matmul with 9*cin contraction depth; f32 accumulation on the MXU.
    patch = patch_ref[...].reshape(th * wd, 9 * cin)        # leading-dim collapse (free)
    acc = jnp.dot(patch, w_ref[...], preferred_element_type=jnp.float32)

    acc = acc + b_ref[...]                                  # broadcast (1, cout)
    alpha = a_ref[0]                                        # scalar from SMEM
    acc = jnp.where(acc >= 0, acc, alpha * acc)             # PReLU (scalar alpha)
    o_ref[...] = acc.reshape(th, wd, cout).astype(o_ref.dtype)


def _pick_tile_rows(h, w, cin, cout, *, budget_bytes=24 * 1024 * 1024, max_rows=512):
    """Largest divisor of h (preferring multiples of 8) whose per-step VMEM fits the budget."""
    in_row = (w + 2) * cin * 2                    # bf16 halo'd input row
    out_row = w * cout * 4                        # f32 output row
    work_row = w * (9 * cin * 2 + cout * 4)       # im2col patch (bf16) + f32 accumulator
    fixed = 9 * cin * cout * 2 + 8 * cout + (1 << 12)

    def vmem_est(th):
        # double-buffered in/out blocks + per-step working set + resident weights/bias
        return 2 * (th + 2) * in_row + 2 * th * out_row + th * work_row + fixed

    divisors = [d for d in range(1, min(h, max_rows) + 1) if h % d == 0]
    fitting = [d for d in divisors if vmem_est(d) <= budget_bytes]
    pref = [d for d in fitting if d % 8 == 0]
    if pref:
        return max(pref)
    if fitting:
        return max(fitting)
    return min(divisors)   # degenerate fallback; still correct


def upsample_block(x_nchw, w_oihw, bias, alpha, up_scale, *, tile_rows=None):
    """Forward pass of UpsampleBlock. NCHW in, NCHW out: [N, Cin, H*r, W*r]."""
    N, Cin, H, W = x_nchw.shape
    r = int(up_scale)
    Cout = Cin * r * r
    assert w_oihw.shape == (Cout, Cin, 3, 3)

    TH = _pick_tile_rows(H, W, Cin, Cout) if tile_rows is None else int(tile_rows)
    assert H % TH == 0, (H, TH)
    nT = H // TH

    # --- glue (layout only): NCHW -> channels-last, zero-pad the 3x3 halo, bf16 cast.
    x = jnp.transpose(x_nchw, (0, 2, 3, 1)).astype(jnp.bfloat16)   # (N, H, W, Cin)
    xp = jnp.pad(x, ((0, 0), (1, 1), (1, 1), (0, 0)))              # (N, H+2, W+2, Cin)
    if nT == 1:
        # Common SR case: the whole padded image is one row tile -> pass it directly,
        # no halo duplication and no extra HBM copy pass.
        tiles = xp[:, None]                                        # (N, 1, H+2, W+2, Cin)
    else:
        # Row tiles carry their own 1-row halo so each grid step is an independent
        # rectangular block that BlockSpec can pipeline (only a 2-row overlap per tile).
        tiles = jnp.stack([xp[:, t * TH:t * TH + TH + 2] for t in range(nT)],
                          axis=1)                                  # (N, nT, TH+2, W+2, Cin)

    # weight (Cout, Cin, 3, 3) -> im2col layout (9*Cin, Cout), rows ordered (ky, kx, cin)
    wmat = jnp.transpose(w_oihw, (2, 3, 1, 0)).reshape(9 * Cin, Cout).astype(jnp.bfloat16)
    b2 = bias.reshape(1, Cout).astype(jnp.float32)
    a1 = jnp.asarray(alpha, jnp.float32).reshape(1)

    kernel = functools.partial(_conv3x3_bias_prelu_kernel, th=TH, wd=W, cin=Cin, cout=Cout)

    conv = pl.pallas_call(
        kernel,
        out_shape=jax.ShapeDtypeStruct((N, H, W, Cout), jnp.float32),
        grid=(N, nT),
        in_specs=[
            # per-(batch, row-tile) padded input slab; leading size-1 dims squeezed
            pl.BlockSpec((None, None, TH + 2, W + 2, Cin), lambda n, t: (n, t, 0, 0, 0)),
            # weights / bias: constant block index -> stay VMEM-resident across the grid
            pl.BlockSpec((9 * Cin, Cout), lambda n, t: (0, 0)),
            pl.BlockSpec((1, Cout), lambda n, t: (0, 0)),
            # scalar PReLU alpha lives in SMEM
            pl.BlockSpec(memory_space=pltpu.MemorySpace.SMEM),
        ],
        out_specs=pl.BlockSpec((None, TH, W, Cout), lambda n, t: (n, t, 0, 0)),
        scratch_shapes=[pltpu.VMEM((TH, W, 9 * Cin), jnp.bfloat16)],   # im2col patch
        compiler_params=pltpu.CompilerParams(
            dimension_semantics=("parallel", "parallel"),   # batch & row tiles across TCs
            vmem_limit_bytes=48 * 1024 * 1024,              # well under v7x's 64 MiB/core
        ),
    )(tiles, wmat, b2, a1)

    # --- glue: pixel shuffle (pure permutation; scalar-alpha PReLU commutes with it).
    # Single fused transpose back to NCHW: conv channel index = c*r*r + i*r + j.
    y = conv.reshape(N, H, W, Cin, r, r)
    y = jnp.transpose(y, (0, 3, 1, 4, 2, 5))                  # (N, Cin, H, r, W, r)
    return y.reshape(N, Cin, H * r, W * r)


def reference(x_nchw, w_oihw, bias, alpha, r):
    """Pure-JAX reference matching the PyTorch module; operands bf16-quantized to match
    the kernel's deliberate mixed precision (bf16 inputs, f32 accumulation)."""
    xq = x_nchw.astype(jnp.bfloat16).astype(jnp.float32)
    wq = w_oihw.astype(jnp.bfloat16).astype(jnp.float32)
    y = lax.conv_general_dilated(
        xq, wq, window_strides=(1, 1), padding=((1, 1), (1, 1)),
        dimension_numbers=("NCHW", "OIHW", "NCHW"),
        precision=lax.Precision.HIGHEST)
    y = y + bias.reshape(1, -1, 1, 1).astype(jnp.float32)
    N, C, H, W = y.shape
    Co = C // (r * r)
    y = y.reshape(N, Co, r, r, H, W)
    y = jnp.transpose(y, (0, 1, 4, 2, 5, 3)).reshape(N, Co, H * r, W * r)
    return jnp.where(y >= 0, y, alpha * y)


if __name__ == "__main__":
    # Small deterministic example: batch=2, in_channels=4, spatial=16, up_scale=2
    N, Cin, H, W = 2, 4, 16, 16
    r = 2
    Cout = Cin * r * r

    key = jax.random.PRNGKey(0)
    kx_, kw_, kb_ = jax.random.split(key, 3)
    x = jax.random.normal(kx_, (N, Cin, H, W), dtype=jnp.float32)
    w = jax.random.normal(kw_, (Cout, Cin, 3, 3), dtype=jnp.float32) * 0.1
    b = jax.random.normal(kb_, (Cout,), dtype=jnp.float32) * 0.1
    alpha = jnp.float32(0.25)  # nn.PReLU() default init

    ref = jax.block_until_ready(reference(x, w, b, alpha, r))

    # Default tiling: whole image in one row tile (common SR case, no halo duplication).
    out = jax.block_until_ready(upsample_block(x, w, b, alpha, r))
    assert out.shape == (N, Cin, H * r, W * r), out.shape
    assert jnp.allclose(out, ref, rtol=1e-3, atol=1e-3), float(jnp.max(jnp.abs(out - ref)))

    # Forced row tiling: grid (N, H//8) = (2, 2) exercises the halo'd multi-tile path.
    out_t = jax.block_until_ready(upsample_block(x, w, b, alpha, r, tile_rows=8))
    assert jnp.allclose(out_t, ref, rtol=1e-3, atol=1e-3), float(jnp.max(jnp.abs(out_t - ref)))

    print("KERNEL_OK")
</pallas_src>

<mosaic_0001>
module attributes {stable_mosaic.version = 11 : i64} {
  func.func @_conv3x3_bias_prelu_kernel(%arg0: i32, %arg1: i32, %arg2: memref<1x1x18x18x4xbf16, #tpu.memory_space<vmem>>, %arg3: memref<36x16xbf16, #tpu.memory_space<vmem>>, %arg4: memref<1x16xf32, #tpu.memory_space<vmem>>, %arg5: memref<1xf32, #tpu.memory_space<smem>>, %arg6: memref<1x16x16x16xf32, #tpu.memory_space<vmem>>, %arg7: memref<16x16x36xbf16, #tpu.memory_space<vmem>>) attributes {dimension_semantics = [#tpu.dimension_semantics<parallel>, #tpu.dimension_semantics<parallel>], iteration_bounds = array<i64: 2, 1>, scalar_prefetch = 0 : i64, scratch_operands = 1 : i64, tpu.core_type = #tpu.core_type<tc>, window_params = [{transform_indices = @transform_0, window_bounds = array<i64: 1, 1, 18, 18, 4>}, {pipeline_mode = #tpu.pipeline_mode<synchronous>, transform_indices = @transform_1, window_bounds = array<i64: 36, 16>}, {pipeline_mode = #tpu.pipeline_mode<synchronous>, transform_indices = @transform_2, window_bounds = array<i64: 1, 16>}, {transform_indices = @transform_3, window_bounds = array<i64: 1>}, {transform_indices = @transform_4, window_bounds = array<i64: 1, 16, 16, 16>}]} {
    %c0 = arith.constant 0 : index
    %c0_0 = arith.constant 0 : index
    %c0_1 = arith.constant 0 : index
    %c0_2 = arith.constant 0 : index
    %c0_3 = arith.constant 0 : index
    %0 = vector.load %arg2[%c0, %c0_0, %c0_1, %c0_2, %c0_3] : memref<1x1x18x18x4xbf16, #tpu.memory_space<vmem>>, vector<1x1x16x16x4xbf16>
    %1 = vector.shape_cast %0 : vector<1x1x16x16x4xbf16> to vector<16x16x4xbf16>
    %c0_4 = arith.constant 0 : index
    %c0_5 = arith.constant 0 : index
    %c0_6 = arith.constant 0 : index
    %2 = vector.load %arg7[%c0_4, %c0_5, %c0_6] : memref<16x16x36xbf16, #tpu.memory_space<vmem>>, vector<16x16x4xbf16>
    tpu.vector_store %arg7[%c0_4, %c0_5, %c0_6], %1 {strides = array<i32>} : memref<16x16x36xbf16, #tpu.memory_space<vmem>>, vector<16x16x4xbf16>,
    %c0_7 = arith.constant 0 : index
    %c0_8 = arith.constant 0 : index
    %c0_9 = arith.constant 0 : index
    %c1 = arith.constant 1 : index
    %c0_10 = arith.constant 0 : index
    %3 = vector.load %arg2[%c0_7, %c0_8, %c0_9, %c1, %c0_10] : memref<1x1x18x18x4xbf16, #tpu.memory_space<vmem>>, vector<1x1x16x16x4xbf16>
    %4 = vector.shape_cast %3 : vector<1x1x16x16x4xbf16> to vector<16x16x4xbf16>
    %c0_11 = arith.constant 0 : index
    %c0_12 = arith.constant 0 : index
    %c4 = arith.constant 4 : index
    %5 = vector.load %arg7[%c0_11, %c0_12, %c4] : memref<16x16x36xbf16, #tpu.memory_space<vmem>>, vector<16x16x4xbf16>
    tpu.vector_store %arg7[%c0_11, %c0_12, %c4], %4 {strides = array<i32>} : memref<16x16x36xbf16, #tpu.memory_space<vmem>>, vector<16x16x4xbf16>,
    %c0_13 = arith.constant 0 : index
    %c0_14 = arith.constant 0 : index
    %c0_15 = arith.constant 0 : index
    %c2 = arith.constant 2 : index
    %c0_16 = arith.constant 0 : index
    %6 = vector.load %arg2[%c0_13, %c0_14, %c0_15, %c2, %c0_16] : memref<1x1x18x18x4xbf16, #tpu.memory_space<vmem>>, vector<1x1x16x16x4xbf16>
    %7 = vector.shape_cast %6 : vector<1x1x16x16x4xbf16> to vector<16x16x4xbf16>
    %c0_17 = arith.constant 0 : index
    %c0_18 = arith.constant 0 : index
    %c8 = arith.constant 8 : index
    %8 = vector.load %arg7[%c0_17, %c0_18, %c8] : memref<16x16x36xbf16, #tpu.memory_space<vmem>>, vector<16x16x4xbf16>
    tpu.vector_store %arg7[%c0_17, %c0_18, %c8], %7 {strides = array<i32>} : memref<16x16x36xbf16, #tpu.memory_space<vmem>>, vector<16x16x4xbf16>,
    %c0_19 = arith.constant 0 : index
    %c0_20 = arith.constant 0 : index
    %c1_21 = arith.constant 1 : index
    %c0_22 = arith.constant 0 : index
    %c0_23 = arith.constant 0 : index
    %9 = vector.load %arg2[%c0_19, %c0_20, %c1_21, %c0_22, %c0_23] : memref<1x1x18x18x4xbf16, #tpu.memory_space<vmem>>, vector<1x1x16x16x4xbf16>
    %10 = vector.shape_cast %9 : vector<1x1x16x16x4xbf16> to vector<16x16x4xbf16>
    %c0_24 = arith.constant 0 : index
    %c0_25 = arith.constant 0 : index
    %c12 = arith.constant 12 : index
    %11 = vector.load %arg7[%c0_24, %c0_25, %c12] : memref<16x16x36xbf16, #tpu.memory_space<vmem>>, vector<16x16x4xbf16>
    tpu.vector_store %arg7[%c0_24, %c0_25, %c12], %10 {strides = array<i32>} : memref<16x16x36xbf16, #tpu.memory_space<vmem>>, vector<16x16x4xbf16>,
    %c0_26 = arith.constant 0 : index
    %c0_27 = arith.constant 0 : index
    %c1_28 = arith.constant 1 : index
    %c1_29 = arith.constant 1 : index
    %c0_30 = arith.constant 0 : index
    %12 = vector.load %arg2[%c0_26, %c0_27, %c1_28, %c1_29, %c0_30] : memref<1x1x18x18x4xbf16, #tpu.memory_space<vmem>>, vector<1x1x16x16x4xbf16>
    %13 = vector.shape_cast %12 : vector<1x1x16x16x4xbf16> to vector<16x16x4xbf16>
    %c0_31 = arith.constant 0 : index
    %c0_32 = arith.constant 0 : index
    %c16 = arith.constant 16 : index
    %14 = vector.load %arg7[%c0_31, %c0_32, %c16] : memref<16x16x36xbf16, #tpu.memory_space<vmem>>, vector<16x16x4xbf16>
    tpu.vector_store %arg7[%c0_31, %c0_32, %c16], %13 {strides = array<i32>} : memref<16x16x36xbf16, #tpu.memory_space<vmem>>, vector<16x16x4xbf16>,
    %c0_33 = arith.constant 0 : index
    %c0_34 = arith.constant 0 : index
    %c1_35 = arith.constant 1 : index
    %c2_36 = arith.constant 2 : index
    %c0_37 = arith.constant 0 : index
    %15 = vector.load %arg2[%c0_33, %c0_34, %c1_35, %c2_36, %c0_37] : memref<1x1x18x18x4xbf16, #tpu.memory_space<vmem>>, vector<1x1x16x16x4xbf16>
    %16 = vector.shape_cast %15 : vector<1x1x16x16x4xbf16> to vector<16x16x4xbf16>
    %c0_38 = arith.constant 0 : index
    %c0_39 = arith.constant 0 : index
    %c20 = arith.constant 20 : index
    %17 = vector.load %arg7[%c0_38, %c0_39, %c20] : memref<16x16x36xbf16, #tpu.memory_space<vmem>>, vector<16x16x4xbf16>
    tpu.vector_store %arg7[%c0_38, %c0_39, %c20], %16 {strides = array<i32>} : memref<16x16x36xbf16, #tpu.memory_space<vmem>>, vector<16x16x4xbf16>,
    %c0_40 = arith.constant 0 : index
    %c0_41 = arith.constant 0 : index
    %c2_42 = arith.constant 2 : index
    %c0_43 = arith.constant 0 : index
    %c0_44 = arith.constant 0 : index
    %18 = vector.load %arg2[%c0_40, %c0_41, %c2_42, %c0_43, %c0_44] : memref<1x1x18x18x4xbf16, #tpu.memory_space<vmem>>, vector<1x1x16x16x4xbf16>
    %19 = vector.shape_cast %18 : vector<1x1x16x16x4xbf16> to vector<16x16x4xbf16>
    %c0_45 = arith.constant 0 : index
    %c0_46 = arith.constant 0 : index
    %c24 = arith.constant 24 : index
    %20 = vector.load %arg7[%c0_45, %c0_46, %c24] : memref<16x16x36xbf16, #tpu.memory_space<vmem>>, vector<16x16x4xbf16>
    tpu.vector_store %arg7[%c0_45, %c0_46, %c24], %19 {strides = array<i32>} : memref<16x16x36xbf16, #tpu.memory_space<vmem>>, vector<16x16x4xbf16>,
    %c0_47 = arith.constant 0 : index
    %c0_48 = arith.constant 0 : index
    %c2_49 = arith.constant 2 : index
    %c1_50 = arith.constant 1 : index
    %c0_51 = arith.constant 0 : index
    %21 = vector.load %arg2[%c0_47, %c0_48, %c2_49, %c1_50, %c0_51] : memref<1x1x18x18x4xbf16, #tpu.memory_space<vmem>>, vector<1x1x16x16x4xbf16>
    %22 = vector.shape_cast %21 : vector<1x1x16x16x4xbf16> to vector<16x16x4xbf16>
    %c0_52 = arith.constant 0 : index
    %c0_53 = arith.constant 0 : index
    %c28 = arith.constant 28 : index
    %23 = vector.load %arg7[%c0_52, %c0_53, %c28] : memref<16x16x36xbf16, #tpu.memory_space<vmem>>, vector<16x16x4xbf16>
    tpu.vector_store %arg7[%c0_52, %c0_53, %c28], %22 {strides = array<i32>} : memref<16x16x36xbf16, #tpu.memory_space<vmem>>, vector<16x16x4xbf16>,
    %c0_54 = arith.constant 0 : index
    %c0_55 = arith.constant 0 : index
    %c2_56 = arith.constant 2 : index
    %c2_57 = arith.constant 2 : index
    %c0_58 = arith.constant 0 : index
    %24 = vector.load %arg2[%c0_54, %c0_55, %c2_56, %c2_57, %c0_58] : memref<1x1x18x18x4xbf16, #tpu.memory_space<vmem>>, vector<1x1x16x16x4xbf16>
    %25 = vector.shape_cast %24 : vector<1x1x16x16x4xbf16> to vector<16x16x4xbf16>
    %c0_59 = arith.constant 0 : index
    %c0_60 = arith.constant 0 : index
    %c32 = arith.constant 32 : index
    %26 = vector.load %arg7[%c0_59, %c0_60, %c32] : memref<16x16x36xbf16, #tpu.memory_space<vmem>>, vector<16x16x4xbf16>
    tpu.vector_store %arg7[%c0_59, %c0_60, %c32], %25 {strides = array<i32>} : memref<16x16x36xbf16, #tpu.memory_space<vmem>>, vector<16x16x4xbf16>,
    %c0_61 = arith.constant 0 : index
    %c0_62 = arith.constant 0 : index
    %c0_63 = arith.constant 0 : index
    %27 = vector.load %arg7[%c0_61, %c0_62, %c0_63] : memref<16x16x36xbf16, #tpu.memory_space<vmem>>, vector<16x16x36xbf16>
    %28 = vector.shape_cast %27 : vector<16x16x36xbf16> to vector<256x36xbf16>
    %c0_64 = arith.constant 0 : index
    %c0_65 = arith.constant 0 : index
    %29 = vector.load %arg3[%c0_64, %c0_65] : memref<36x16xbf16, #tpu.memory_space<vmem>>, vector<36x16xbf16>
    %cst = arith.constant dense<0.000000e+00> : vector<256x16xf32>
    %30 = tpu.matmul %28, %29, %cst {dimension_numbers = #tpu.dot_dimension_numbers<[1], [0], [0], [1], [0, 0, 1, 1], [], []>} : vector<256x36xbf16>, vector<36x16xbf16>, vector<256x16xf32> -> vector<256x16xf32>
    %c0_66 = arith.constant 0 : index
    %c0_67 = arith.constant 0 : index
    %31 = vector.load %arg4[%c0_66, %c0_67] : memref<1x16xf32, #tpu.memory_space<vmem>>, vector<1x16xf32>
    %32 = vector.broadcast %31 : vector<1x16xf32> to vector<256x16xf32>
    %33 = arith.addf %30, %32 : vector<256x16xf32>
    %c0_68 = arith.constant 0 : index
    %34 = memref.load %arg5[%c0_68] : memref<1xf32, #tpu.memory_space<smem>>
    %cst_69 = arith.constant 0.000000e+00 : f32
    %35 = vector.broadcast %cst_69 : f32 to vector<256x16xf32>
    %36 = arith.cmpf oge, %33, %35 : vector<256x16xf32>
    %37 = vector.broadcast %34 : f32 to vector<256x16xf32>
    %38 = arith.mulf %37, %33 : vector<256x16xf32>
    %39 = arith.select %36, %33, %38 : vector<256x16xi1>, vector<256x16xf32>
    %40 = vector.shape_cast %39 : vector<256x16xf32> to vector<16x16x16xf32>
    %c0_70 = arith.constant 0 : index
    %c0_71 = arith.constant 0 : index
    %c0_72 = arith.constant 0 : index
    %c0_73 = arith.constant 0 : index
    %41 = vector.load %arg6[%c0_70, %c0_71, %c0_72, %c0_73] : memref<1x16x16x16xf32, #tpu.memory_space<vmem>>, vector<1x16x16x16xf32>
    %42 = vector.shape_cast %41 : vector<1x16x16x16xf32> to vector<16x16x16xf32>
    %43 = vector.shape_cast %40 : vector<16x16x16xf32> to vector<1x16x16x16xf32>
    tpu.vector_store %arg6[%c0_70, %c0_71, %c0_72, %c0_73], %43 {strides = array<i32>} : memref<1x16x16x16xf32, #tpu.memory_space<vmem>>, vector<1x16x16x16xf32>,
    return
  }
  func.func @transform_0(%arg0: i32, %arg1: i32) -> (i32, i32, i32, i32, i32) {
    %c0_i32 = arith.constant 0 : i32
    %c0_i32_0 = arith.constant 0 : i32
    %c0_i32_1 = arith.constant 0 : i32
    %c0_i32_2 = arith.constant 0 : i32
    return %arg0, %arg1, %c0_i32, %c0_i32_0, %c0_i32_1 : i32, i32, i32, i32, i32
  }
  func.func @transform_1(%arg0: i32, %arg1: i32) -> (i32, i32) {
    %c0_i32 = arith.constant 0 : i32
    %c0_i32_0 = arith.constant 0 : i32
    %c0_i32_1 = arith.constant 0 : i32
    return %c0_i32, %c0_i32_0 : i32, i32
  }
  func.func @transform_2(%arg0: i32, %arg1: i32) -> (i32, i32) {
    %c0_i32 = arith.constant 0 : i32
    %c0_i32_0 = arith.constant 0 : i32
    %c0_i32_1 = arith.constant 0 : i32
    return %c0_i32, %c0_i32_0 : i32, i32
  }
  func.func @transform_3(%arg0: i32, %arg1: i32) -> i32 {
    %c0_i32 = arith.constant 0 : i32
    %c0_i32_0 = arith.constant 0 : i32
    return %c0_i32 : i32
  }
  func.func @transform_4(%arg0: i32, %arg1: i32) -> (i32, i32, i32, i32) {
    %c0_i32 = arith.constant 0 : i32
    %c0_i32_0 = arith.constant 0 : i32
    %c0_i32_1 = arith.constant 0 : i32
    return %arg0, %arg1, %c0_i32, %c0_i32_0 : i32, i32, i32, i32
  }
}

</mosaic_0001>

<bundles_post_ra>
// kernel: tpu_custom_call.1
= control target key start
LH: loop header
LB: loop body
LE: loop exit
PB: predicated region body
PF: predicated region fallthrough
CT: control target
= control target key end

     0   :  { %s5308_s0 = inlined_call_operand.vmem [shape: bf16[2,1,18,18,4], index: 0, kind: input, shape index: {}]   ;;  %s5309_s1 = inlined_call_operand.vmem [shape: bf16[36,16], index: 1, kind: input, shape index: {}]   ;;  %s5310_s2 = inlined_call_operand.vmem [shape: f32[1,16], index: 2, kind: input, shape index: {}]   ;;  %s5311_s3 = inlined_call_operand.<no memory space> [shape: f32[1], index: 3, kind: input, shape index: {}]   ;;  %s5312_s4 = inlined_call_operand.hbm [shape: f32[2,16,16,16], index: 4, kind: output, shape index: {}]  }
   0x1   :  { %9 = sst [smem:[#allocation3]] %s5311_s3 }
   0x2   :  { %10 = vsyncpa [#allocation5], 0 }
   0x3   :  { %12 = vsyncpa [#allocation5 + $0x1], 0  ;;  %s4403_s17 = smov 0   ;;  %s4405_s18 = smov 0  }
   0x4   :  { %s4407_s19 = smov 0   ;;  %s4409_s20 = smov 0  }
   0x5   :  { %s4411_s21 = smov 0   ;;  %s4413_s22 = smov 0  }
   0x6 LB: > { %s3383_s3 = sadd.s32 4294967295, %s4363_s22   ;;  %s3384_s23 = sadd.s32 4294967294, %s4363_s22   ;;  %s4363_s22 = sphi %s4413_s22, %s18_s22   ;;  %s4359_s21 = sphi %s4411_s21, %s5319_s21   ;;  %s4355_s20 = sphi %s4409_s20, %s5318_s20   ;;  %s4351_s19 = sphi %s4407_s19, %s5317_s19   ;;  %s4347_s18 = sphi %s4405_s18, %s5316_s18   ;;  %s4343_s17 = sphi %s4403_s17, %s5315_s17  }
   0x7   : > { %s30_s24 = sadd.s32 1, %s4359_s21  ;;  %s130_s25 = sadd.s32 1, %s4351_s19 }
   0x8   : > { %p32_p0 = scmp.ge.s32.totalorder %s30_s24, 2  ;;  %p140_p1 = scmp.ne.s32.totalorder %s4351_s19, %s4347_s18 }
   0x9   : > { %p141_p2 = scmp.eq.s32.totalorder %s3383_s3, 1  ;;  %p146_p3 = scmp.ne.s32.totalorder %s4347_s18, %s4343_s17 }
   0xa   : > { %s5321_s24 = smov (%p32_p0, %s30_s24), 0  ;;  %p147_p5 = scmp.eq.s32.totalorder %s3384_s23, 1 }
   0xb   : > { %p4443_p4 = por %p141_p2, %p140_p1  ;;  %s125_s27 = ssub.s32 %s4359_s21, %s5321_s24 }
   0xc   : > { %p3387_p6 = scmp.ge.s32.totalorder %s4363_s22, 1  ;;  %p128_p7 = scmp.eq.s32.totalorder %s125_s27, 0 }
   0xd   : > { %p4450_p8 = por %p147_p5, %p146_p3  ;;  %p186_p9 = scmp.lt.s32.totalorder %s4363_s22, 3 }
   0xe   : > { %s4456_s29 = scalar_select %p128_p7, %s4351_s19, %s130_s25  }
   0xf   : > { %p187_p10 = pnand %p3387_p6, %p186_p9 }
  0x10   : > { %p216_p11 = scmp.lt.s32.totalorder (!%p187_p10), %s4355_s20, 1  ;;  %vm982_vm0 = vcmask (!%p187_p10), 1046528   ;;  %s4365_s9 = smov (!%p187_p10), 12   ;;  %vm548_vm1 = vsmask.f32 (!%p187_p10), 7424  ;;  %vm355_vm2 = vcmask (!%p187_p10), 31744  }
  0x11   : > { %190 = sbr.rel (%p187_p10) target bundleno = 643 (0x283), region = 36  ;;  %s4366_s10 = smov (!%p187_p10), 8   ;;  %vm789_vm3 = vcmask (!%p187_p10), 64544   ;;  %vm1079_vm4 = vcmask (!%p187_p10), 97344   ;;  %vm1257_vm5 = vcmask (!%p187_p10), 130144   ;;  %vm1690_vm6 = vcmask (!%p187_p10), 162944  }
  0x12   : > { %s4367_s11 = smov (!%p187_p10), 4   ;;  %s4368_s12 = smov (!%p187_p10), 16   ;;  %vm1979_vm7 = vcmask (!%p187_p10), 195744   ;;  %vm2157_vm8 = vcmask (!%p187_p10), 228544   ;;  %vm2590_vm9 = vcmask (!%p187_p10), 261344   ;;  %vm2879_vm10 = vcmask (!%p187_p10), 294144  }
  0x13   : > { %s4369_s13 = smov (!%p187_p10), 20   ;;  %s4370_s14 = smov (!%p187_p10), 24   ;;  %vm2939_vm11 = vcmask (!%p187_p10), 293888   ;;  %vm2988_vm12 = vcmask (!%p187_p10), 1041408   ;;  %vm3251_vm13 = vcmask (!%p187_p10), 130048  }
  0x14   : > { %s4371_s15 = smov (!%p187_p10), 28   ;;  %s4372_s16 = smov (!%p187_p10), 32  }
  0x15   : > { %s3153_s6 = sld [smem:[#allocation3]] (!%p187_p10)  ;;  %s213_s7 = sand.u32 (!%p187_p10), 1, %s4347_s18  }
  0x16   : > { %s5261_s3 = scalar_lea.sflag (!%p187_p10), [#allocation5], %s213_s7  ;;  %s4373_s25 = smov (!%p187_p10), [#allocation4]  }
  0x17   : > { %s4289_s27 = sshll.u32 (!%p187_p10), %s4373_s25, 4  ;;  %s4290_s27 = int_to_ptr.vmem [resolvable:$false] %s4289_s27 }
  0x18   : > { %s217_s30 = scalar_select %p216_p11, %s4355_s20, 1 }
  0x1a   : > { %s3977_s5 = smul.u32 216, %s217_s30  ;;  %s4291_s30 = scalar_lea.vmem %s4290_s27, 8192 }
  0x1c   : > { %s4463_s8 = scalar_lea.vmem %s5308_s0, %s3977_s5 }
  0x1d   : > { %v4042_v0 = vld [vmem:[%s4463_s8 + $0x6c] sm:$0xff]   ;;  %v4044_v2 = vld [vmem:[%s4463_s8 + $0x60] sm:$0xfe]   ;;  %v4045_v3 = vld [vmem:[%s4463_s8 + $0x68] ss:$0 sps:$4 sm:$0x11]  }
  0x1e   : > { %v4043_v1 = vld [vmem:[%s4463_s8 + $0xc] sm:$0xff]   ;;  %1225 = vrot.lane.b32.xlu1 %v4042_v0, %s4365_s9  ;;  %v1007_v5 = vrot.slane %v4044_v2, 1  ;;  %v1008_v6 = vrot.slane %v4045_v3, 1  ;;  %v4046_v7 = vld [vmem:[%s4463_s8] sm:$0xfe]   ;;  %v4060_v58 = vld [vmem:[%s4463_s8 + $0x78] sm:$0xff]  }
  0x1f   : > { %1209 = vrot.lane.b32.xlu0 %v4043_v1, %s4365_s9  ;;  %v4052_v4 = vld [vmem:[%s4463_s8 + $0xc] sm:$0xff]   ;;  %v4047_v8 = vld [vmem:[%s4463_s8 + $0x8] ss:$0 sps:$4 sm:$0x11]   ;;  %v983_v11 = vrot.slane %v4046_v7, 1  ;;  %v4054_v26 = vld [vmem:[%s4463_s8] sm:$0xff]  }
  0x20   : > { %v562_v9 = vshrl.u32 %v4052_v4, 16  ;;  %v1009_v10 = vsel %vm982_vm0, %v1007_v5, %v1008_v6  ;;  %v4048_v12 = vld [vmem:[%s4463_s8 + $0x6c] sm:$0xfe]   ;;  %v564_v13 = vshll.u32 %v4052_v4, 16  ;;  %v984_v14 = vrot.slane %v4047_v8, 1  ;;  %v4058_v38 = vld [vmem:[%s4463_s8 + $0x60] sm:$0xff]  }
  0x21   : > { %v4049_v15 = vld [vmem:[%s4463_s8 + $0x74] ss:$0 sps:$4 sm:$0x11]   ;;  %v1010_v16 = vrot.slane %v4048_v12, 1  ;;  %v4050_v20 = vld [vmem:[%s4463_s8 + $0xc] sm:$0xfe]  }
  0x22   : > { %1047 = vrot.lane.b32.xlu1 %v1009_v10, %s4366_s10  ;;  %v566_v17 = vrot.slane %v564_v13, 1  ;;  %v985_v18 = vsel %vm982_vm0, %v983_v11, %v984_v14  ;;  %v1011_v19 = vrot.slane %v4049_v15, 1  ;;  %v4051_v21 = vld [vmem:[%s4463_s8 + $0x14] ss:$0 sps:$4 sm:$0x11]   ;;  %v986_v23 = vrot.slane %v4050_v20, 1 }
  0x23   : > { %1031 = vrot.lane.b32.xlu0 %v985_v18, %s4366_s10  ;;  %v987_v24 = vrot.slane %v4051_v21, 1  ;;  %v4053_v25 = vld [vmem:[%s4463_s8 + $0x14] ss:$0 sps:$4 sm:$0x11]   ;;  %v550_v31 = vshrl.u32 %v4054_v26, 16  ;;  %v552_v32 = vshll.u32 %v4054_v26, 16 }
  0x24   : > { %v1012_v22 = vsel %vm982_vm0, %v1010_v16, %v1011_v19  ;;  %v567_v27 = vor.u32 %v566_v17, %v562_v9  ;;  %v569_v29 = vshll.u32 %v4053_v25, 16  ;;  %v4055_v30 = vld [vmem:[%s4463_s8 + $0x8] ss:$0 sps:$4 sm:$0x11]   ;;  %v4056_v36 = vld [vmem:[%s4463_s8 + $0x6c] sm:$0xff]   ;;  %v646_v47 = vshrl.u32 %v4058_v38, 16 }
  0x25   : > { %v988_v28 = vsel %vm982_vm0, %v986_v23, %v987_v24  ;;  %v554_v34 = vrot.slane %v552_v32, 1  ;;  %v557_v35 = vshll.u32 %v4055_v30, 16  ;;  %v4057_v37 = vld [vmem:[%s4463_s8 + $0x74] ss:$0 sps:$4 sm:$0x11]   ;;  %v658_v42 = vshrl.u32 %v4056_v36, 16 }
  0x26   : > { %1049 = vrot.lane.b32.xlu1 %v1012_v22, %s4366_s10  ;;  %v571_v33 = vrot.slane %v569_v29, 1  ;;  %v660_v43 = vshll.u32 %v4056_v36, 16  ;;  %v665_v44 = vshll.u32 %v4057_v37, 16  ;;  %v4059_v45 = vld [vmem:[%s4463_s8 + $0x68] ss:$0 sps:$4 sm:$0x11]  }
  0x27   : > { %1033 = vrot.lane.b32.xlu0 %v988_v28, %s4366_s10  ;;  %v555_v40 = vor.u32 %v554_v34, %v550_v31  ;;  %v559_v41 = vrot.slane %v557_v35, 1  ;;  %v648_v48 = vshll.u32 %v4058_v38, 16  ;;  %v653_v51 = vshll.u32 %v4059_v45, 16  ;;  %v4062_v53 = vld [vmem:[%s4463_s8 + $0x6c] sm:$0xff]   ;;  %v4061_v62 = vld [vmem:[%s4463_s8 + $0x18] sm:$0xff]  }
  0x28   : > { %v572_v39 = vsel %vm548_vm1, %v567_v27, %v571_v33  ;;  %v662_v49 = vrot.slane %v660_v43, 1  ;;  %v667_v50 = vrot.slane %v665_v44, 1  ;;  %v4063_v56 = vld [vmem:[%s4463_s8 + $0x74] ss:$0 sps:$4 sm:$0x11]   ;;  %v1547_v59 = vshrl.u32 %v4062_v53, 16 }
  0x29   : > { %v560_v46 = vsel %vm548_vm1, %v555_v40, %v559_v41  ;;  %v650_v52 = vrot.slane %v648_v48, 1  ;;  %v655_v55 = vrot.slane %v653_v51, 1  ;;  %v1549_v60 = vshll.u32 %v4062_v53, 16  ;;  %v4064_v0 = vld [vmem:[%s4463_s8 + $0xc] sm:$0xff]   ;;  %v4066_v7 = vld [vmem:[%s4463_s8 + $0x78] sm:$0xff]  }
  0x2a   : > { %743 = vrot.lane.b32.xlu1 %v572_v39, %s4367_s11  ;;  %v663_v54 = vor.u32 %v662_v49, %v658_v42  ;;  %v1554_v63 = vshll.u32 %v4063_v56, 16  ;;  %v4065_v3 = vld [vmem:[%s4463_s8 + $0x14] ss:$0 sps:$4 sm:$0x11]   ;;  %v1451_v5 = vshrl.u32 %v4064_v0, 16  ;;  %v1453_v6 = vshll.u32 %v4064_v0, 16 }
  0x2b   : > { %741 = vrot.lane.b32.xlu0 %v560_v46, %s4367_s11  ;;  %v651_v57 = vor.u32 %v650_v52, %v646_v47  ;;  %v1551_v2 = vrot.slane %v1549_v60, 1  ;;  %v1458_v9 = vshll.u32 %v4065_v3, 16  ;;  %v4067_v10 = vld [vmem:[%s4463_s8 + $0x80] ss:$0 sps:$4 sm:$0x11]   ;;  %v1559_v12 = vshrl.u32 %v4066_v7, 16 }
  0x2c   : > { %v668_v61 = vsel %vm548_vm1, %v663_v54, %v667_v50  ;;  %v1556_v4 = vrot.slane %v1554_v63, 1  ;;  %v1455_v11 = vrot.slane %v1453_v6, 1  ;;  %v1561_v13 = vshll.u32 %v4066_v7, 16  ;;  %v4068_v14 = vld [vmem:[%s4463_s8 + $0x18] sm:$0xff]   ;;  %v4070_v28 = vld [vmem:[%s4463_s8 + $0x6c] sm:$0xfe]  }
  0x2d   : > { %v656_v1 = vsel %vm548_vm1, %v651_v57, %v655_v55  ;;  %v1552_v8 = vor.u32 %v1551_v2, %v1547_v59  ;;  %v1460_v16 = vrot.slane %v1458_v9, 1  ;;  %v1566_v17 = vshll.u32 %v4067_v10, 16  ;;  %v4069_v20 = vld [vmem:[%s4463_s8 + $0x20] ss:$0 sps:$4 sm:$0x11]   ;;  %v4082_v49 = vld [vmem:[%s4463_s8 + $0x78] sm:$0xff]  }
  0x2e   : > { %759 = vrot.lane.b32.xlu1 %v668_v61, %s4367_s11  ;;  %v1456_v18 = vor.u32 %v1455_v11, %v1451_v5  ;;  %v1563_v19 = vrot.slane %v1561_v13, 1  ;;  %v1463_v21 = vshrl.u32 %v4068_v14, 16  ;;  %v1465_v22 = vshll.u32 %v4068_v14, 16  ;;  %v4071_v29 = vld [vmem:[%s4463_s8 + $0x74] ss:$0 sps:$4 sm:$0x11]  }
  0x2f   : > { %757 = vrot.lane.b32.xlu0 %v656_v1, %s4367_s11  ;;  %v1557_v15 = vsel %vm548_vm1, %v1552_v8, %v1556_v4  ;;  %v1568_v23 = vrot.slane %v1566_v17, 1  ;;  %v1470_v27 = vshll.u32 %v4069_v20, 16  ;;  %v1907_v33 = vrot.slane %v4070_v28, 1  ;;  %v4072_v34 = vld [vmem:[%s4463_s8 + $0xc] sm:$0xfe]   ;;  %v4084_v52 = vld [vmem:[%s4463_s8 + $0x18] sm:$0xff]  }
  0x30   : > { %v1461_v24 = vsel %vm548_vm1, %v1456_v18, %v1460_v16  ;;  %v1564_v25 = vor.u32 %v1563_v19, %v1559_v12  ;;  %v1467_v26 = vrot.slane %v1465_v22, 1  ;;  %v1908_v35 = vrot.slane %v4071_v29, 1  ;;  %v4073_v36 = vld [vmem:[%s4463_s8 + $0x14] ss:$0 sps:$4 sm:$0x11]   ;;  %v4078_v53 = vld [vmem:[%s4463_s8 + $0x78] sm:$0xff]  }
  0x31   : > { %v1472_v32 = vrot.slane %v1470_v27, 1  ;;  %v1883_v38 = vrot.slane %v4072_v34, 1  ;;  %v1884_v39 = vrot.slane %v4073_v36, 1  ;;  %v4074_v40 = vld [vmem:[%s4463_s8 + $0x78] sm:$0xfe]   ;;  %v2447_v56 = vshrl.u32 %v4082_v49, 16 }
  0x32   : > { %1227 = vrot.lane.b32.xlu1 %v4060_v58, %s4365_s9  ;;  %v1569_v30 = vsel %vm548_vm1, %v1564_v25, %v1568_v23  ;;  %v1468_v31 = vor.u32 %v1467_v26, %v1463_v21  ;;  %v4075_v41 = vld [vmem:[%s4463_s8 + $0x80] ss:$0 sps:$4 sm:$0x11]   ;;  %v1909_v42 = vsel %vm982_vm0, %v1907_v33, %v1908_v35  ;;  %v1910_v44 = vrot.slane %v4074_v40, 1  ;;  %v4076_v46 = vld [vmem:[%s4463_s8 + $0x18] sm:$0xfe]  }
  0x33   : > { %1211 = vrot.lane.b32.xlu0 %v4061_v62, %s4365_s9  ;;  %v1885_v43 = vsel %vm982_vm0, %v1883_v38, %v1884_v39  ;;  %v1911_v45 = vrot.slane %v4075_v41, 1  ;;  %v4077_v47 = vld [vmem:[%s4463_s8 + $0x20] ss:$0 sps:$4 sm:$0x11]   ;;  %v1886_v48 = vrot.slane %v4076_v46, 1  ;;  %v4079_v55 = vld [vmem:[%s4463_s8 + $0x18] sm:$0xff]  }
  0x34   : > { %v1473_v37 = vsel %vm548_vm1, %v1468_v31, %v1472_v32  ;;  %v1887_v51 = vrot.slane %v4077_v47, 1  ;;  %v2449_v57 = vshll.u32 %v4082_v49, 16  ;;  %v4083_v58 = vld [vmem:[%s4463_s8 + $0x80] ss:$0 sps:$4 sm:$0x11]   ;;  %v2351_v59 = vshrl.u32 %v4084_v52, 16 }
  0x35   : > { %v1912_v50 = vsel %vm982_vm0, %v1910_v44, %v1911_v45  ;;  %v2353_v61 = vshll.u32 %v4084_v52, 16  ;;  %v4080_v62 = vld [vmem:[%s4463_s8 + $0x84] sm:$0xff]   ;;  %v2454_v63 = vshll.u32 %v4083_v58, 16  ;;  %v4085_v0 = vld [vmem:[%s4463_s8 + $0x20] ss:$0 sps:$4 sm:$0x11]  }
  0x36   : > { %1658 = vrot.lane.b32.xlu1 %v1557_v15, %s4368_s12  ;;  %v1888_v54 = vsel %vm982_vm0, %v1886_v48, %v1887_v51  ;;  %v2451_v60 = vrot.slane %v2449_v57, 1  ;;  %v4081_v1 = vld [vmem:[%s4463_s8 + $0x24] sm:$0xff]   ;;  %v2358_v5 = vshll.u32 %v4085_v0, 16  ;;  %v4087_v6 = vld [vmem:[%s4463_s8 + $0x8c] ss:$0 sps:$4 sm:$0x11]  }
  0x37   : > { %1642 = vrot.lane.b32.xlu0 %v1461_v24, %s4368_s12  ;;  %v2355_v2 = vrot.slane %v2353_v61, 1  ;;  %v4086_v3 = vld [vmem:[%s4463_s8 + $0x84] sm:$0xff]   ;;  %v2456_v4 = vrot.slane %v2454_v63, 1  ;;  %v2466_v13 = vshll.u32 %v4087_v6, 16  ;;  %v4094_v14 = vld [vmem:[%s4463_s8 + $0x78] sm:$0xff]  }
  0x38   : > { %v4088_v7 = vld [vmem:[%s4463_s8 + $0x24] sm:$0xff]   ;;  %v2452_v8 = vor.u32 %v2451_v60, %v2447_v56  ;;  %v2459_v9 = vshrl.u32 %v4086_v3, 16  ;;  %v2461_v10 = vshll.u32 %v4086_v3, 16  ;;  %v2360_v12 = vrot.slane %v2358_v5, 1  ;;  %v4090_v25 = vld [vmem:[%s4463_s8 + $0x78] sm:$0xfe]  }
  0x39   : > { %v2356_v11 = vor.u32 %v2355_v2, %v2351_v59  ;;  %v4089_v16 = vld [vmem:[%s4463_s8 + $0x2c] ss:$0 sps:$4 sm:$0x11]   ;;  %v2363_v17 = vshrl.u32 %v4088_v7, 16  ;;  %v2365_v18 = vshll.u32 %v4088_v7, 16  ;;  %v2468_v19 = vrot.slane %v2466_v13, 1 }
  0x3a   : > { %1660 = vrot.lane.b32.xlu1 %v1569_v30, %s4368_s12  ;;  %v2463_v15 = vrot.slane %v2461_v10, 1  ;;  %v670_v20 = vshrl.u32 %v4094_v14, 16  ;;  %v2457_v21 = vsel %vm548_vm1, %v2452_v8, %v2456_v4  ;;  %v2370_v24 = vshll.u32 %v4089_v16, 16  ;;  %v4091_v27 = vld [vmem:[%s4463_s8 + $0x80] ss:$0 sps:$4 sm:$0x11]  }
  0x3b   : > { %1644 = vrot.lane.b32.xlu0 %v1473_v37, %s4368_s12  ;;  %v2367_v23 = vrot.slane %v2365_v18, 1  ;;  %v2361_v26 = vsel %vm548_vm1, %v2356_v11, %v2360_v12  ;;  %v672_v28 = vshll.u32 %v4094_v14, 16  ;;  %v2807_v31 = vrot.slane %v4090_v25, 1  ;;  %v4096_v32 = vld [vmem:[%s4463_s8 + $0x18] sm:$0xff]   ;;  %v4098_v51 = vld [vmem:[%s4463_s8 + $0x84] sm:$0xfe]  }
  0x3c   : > { %v2464_v22 = vor.u32 %v2463_v15, %v2459_v9  ;;  %v2372_v30 = vrot.slane %v2370_v24, 1  ;;  %v2808_v33 = vrot.slane %v4091_v27, 1  ;;  %v4092_v34 = vld [vmem:[%s4463_s8 + $0x18] sm:$0xfe]   ;;  %v574_v46 = vshrl.u32 %v4096_v32, 16  ;;  %v4102_v52 = vld [vmem:[%s4463_s8 + $0x84] sm:$0xff]  }
  0x3d   : > { %v2368_v29 = vor.u32 %v2367_v23, %v2363_v17  ;;  %v4093_v35 = vld [vmem:[%s4463_s8 + $0x20] ss:$0 sps:$4 sm:$0x11]   ;;  %v2783_v38 = vrot.slane %v4092_v34, 1  ;;  %v674_v41 = vrot.slane %v672_v28, 1  ;;  %v576_v47 = vshll.u32 %v4096_v32, 16 }
  0x3e   : > { %1947 = vrot.lane.b32.xlu1 %v1909_v42, %s4369_s13  ;;  %v2469_v36 = vsel %vm548_vm1, %v2464_v22, %v2468_v19  ;;  %v2784_v39 = vrot.slane %v4093_v35, 1  ;;  %v4095_v40 = vld [vmem:[%s4463_s8 + $0x80] ss:$0 sps:$4 sm:$0x11]   ;;  %v2809_v44 = vsel %vm982_vm0, %v2807_v31, %v2808_v33  ;;  %v2810_v56 = vrot.slane %v4098_v51, 1  ;;  %v4104_v57 = vld [vmem:[%s4463_s8 + $0x24] sm:$0xff]  }
  0x3f   : > { %1931 = vrot.lane.b32.xlu0 %v1885_v43, %s4369_s13  ;;  %v2373_v37 = vsel %vm548_vm1, %v2368_v29, %v2372_v30  ;;  %v677_v42 = vshll.u32 %v4095_v40, 16  ;;  %v4097_v43 = vld [vmem:[%s4463_s8 + $0x20] ss:$0 sps:$4 sm:$0x11]   ;;  %v675_v45 = vor.u32 %v674_v41, %v670_v20  ;;  %v4100_v61 = vld [vmem:[%s4463_s8 + $0x24] sm:$0xfe]  }
  0x40   : > { %v2785_v48 = vsel %vm982_vm0, %v2783_v38, %v2784_v39  ;;  %v2786_v0 = vrot.slane %v4100_v61, 1  ;;  %v4103_v2 = vld [vmem:[%s4463_s8 + $0x8c] ss:$0 sps:$4 sm:$0x11]   ;;  %v682_v3 = vshrl.u32 %v4102_v52, 16  ;;  %v684_v4 = vshll.u32 %v4102_v52, 16 }
  0x41   : > { %v679_v49 = vrot.slane %v677_v42, 1  ;;  %v689_v6 = vshll.u32 %v4103_v2, 16  ;;  %v4105_v7 = vld [vmem:[%s4463_s8 + $0x2c] ss:$0 sps:$4 sm:$0x11]   ;;  %v586_v10 = vshrl.u32 %v4104_v57, 16 }
  0x42   : > { %1949 = vrot.lane.b32.xlu1 %v1912_v50, %s4369_s13  ;;  %v581_v50 = vshll.u32 %v4097_v43, 16  ;;  %v686_v9 = vrot.slane %v684_v4, 1  ;;  %v588_v11 = vshll.u32 %v4104_v57, 16  ;;  %v593_v13 = vshll.u32 %v4105_v7, 16  ;;  %v4106_v16 = vld [vmem:[%s4463_s8 + $0x78] sm:$0xfe]  }
  0x43   : > { %1933 = vrot.lane.b32.xlu0 %v1888_v54, %s4369_s13  ;;  %v4099_v54 = vld [vmem:[%s4463_s8 + $0x8c] ss:$0 sps:$4 sm:$0x11]   ;;  %v680_v58 = vsel %vm548_vm1, %v675_v45, %v679_v49  ;;  %v691_v12 = vrot.slane %v689_v6, 1  ;;  %v4108_v23 = vld [vmem:[%s4463_s8 + $0x18] sm:$0xfe]  }
  0x44   : > { %v2811_v60 = vrot.slane %v4099_v54, 1  ;;  %v687_v14 = vor.u32 %v686_v9, %v682_v3  ;;  %v590_v15 = vrot.slane %v588_v11, 1  ;;  %v4107_v17 = vld [vmem:[%s4463_s8 + $0x80] ss:$0 sps:$4 sm:$0x11]   ;;  %v595_v18 = vrot.slane %v593_v13, 1 }
  0x45   : > { %v1014_v22 = vrot.slane %v4107_v17, 1  ;;  %v4109_v24 = vld [vmem:[%s4463_s8 + $0x20] ss:$0 sps:$4 sm:$0x11]   ;;  %v4118_v27 = vld [vmem:[%s4463_s8 + $0x84] sm:$0xff]   ;;  %v4117_v51 = vld [vmem:[%s4463_s8 + $0x30] sm:$0xff]  }
  0x46   : > { %2125 = vrot.lane.b32.xlu1 %v4078_v53, %s4370_s14  ;;  %v578_v53 = vrot.slane %v576_v47, 1  ;;  %v2812_v5 = vsel %vm982_vm0, %v2810_v56, %v2811_v60  ;;  %v692_v19 = vsel %vm548_vm1, %v687_v14, %v691_v12  ;;  %v591_v20 = vor.u32 %v590_v15, %v586_v10  ;;  %v4110_v30 = vld [vmem:[%s4463_s8 + $0x84] sm:$0xfe]   ;;  %v4111_v31 = vld [vmem:[%s4463_s8 + $0x8c] ss:$0 sps:$4 sm:$0x11]  }
  0x47   : > { %2109 = vrot.lane.b32.xlu0 %v4079_v55, %s4370_s14  ;;  %v583_v55 = vrot.slane %v581_v50, 1  ;;  %v990_v29 = vrot.slane %v4109_v24, 1  ;;  %v1016_v33 = vrot.slane %v4110_v30, 1  ;;  %v1017_v34 = vrot.slane %v4111_v31, 1  ;;  %v4112_v35 = vld [vmem:[%s4463_s8 + $0x24] sm:$0xfe]  }
  0x48   : > { %v579_v59 = vor.u32 %v578_v53, %v574_v46  ;;  %v596_v25 = vsel %vm548_vm1, %v591_v20, %v595_v18  ;;  %v992_v39 = vrot.slane %v4112_v35, 1  ;;  %v1573_v40 = vshll.u32 %v4118_v27, 16  ;;  %v4114_v42 = vld [vmem:[%s4463_s8 + $0x84] sm:$0xff]   ;;  %v4116_v50 = vld [vmem:[%s4463_s8 + $0x90] sm:$0xff]  }
  0x49   : > { %v1018_v38 = vsel %vm982_vm0, %v1016_v33, %v1017_v34  ;;  %v4120_v43 = vld [vmem:[%s4463_s8 + $0x24] sm:$0xff]   ;;  %v4121_v53 = vld [vmem:[%s4463_s8 + $0x2c] ss:$0 sps:$4 sm:$0x11]   ;;  %v4132_v30 = vld [vmem:[%s4463_s8 + $0x30] sm:$0xfe]  }
  0x4a   : > { %2127 = vrot.lane.b32.xlu1 %v4080_v62, %s4370_s14  ;;  %v4101_v62 = vld [vmem:[%s4463_s8 + $0x2c] ss:$0 sps:$4 sm:$0x11]   ;;  %v584_v63 = vsel %vm548_vm1, %v579_v59, %v583_v55  ;;  %v1575_v46 = vrot.slane %v1573_v40, 1  ;;  %v1475_v47 = vshrl.u32 %v4120_v43, 16  ;;  %v1477_v49 = vshll.u32 %v4120_v43, 16 }
  0x4b   : > { %2111 = vrot.lane.b32.xlu0 %v4081_v1, %s4370_s14  ;;  %v2787_v1 = vrot.slane %v4101_v62, 1  ;;  %v4122_v55 = vld [vmem:[%s4463_s8 + $0x90] sm:$0xff]   ;;  %v4123_v59 = vld [vmem:[%s4463_s8 + $0x98] ss:$0 sps:$4 sm:$0x11]   ;;  %v1892_v34 = vrot.slane %v4132_v30, 1 }
  0x4c   : > { %v1479_v54 = vrot.slane %v1477_v49, 1  ;;  %v1583_v60 = vshrl.u32 %v4122_v55, 16  ;;  %v1585_v62 = vshll.u32 %v4122_v55, 16  ;;  %v4125_v2 = vld [vmem:[%s4463_s8 + $0x38] ss:$0 sps:$4 sm:$0x11]  }
  0x4d   : > { %v2788_v8 = vsel %vm982_vm0, %v2786_v0, %v2787_v1  ;;  %v1590_v1 = vshll.u32 %v4123_v59, 16  ;;  %v4126_v12 = vld [vmem:[%s4463_s8 + $0x84] sm:$0xfe]   ;;  %v4127_v13 = vld [vmem:[%s4463_s8 + $0x8c] ss:$0 sps:$4 sm:$0x11]  }
  0x4e   : > { %2558 = vrot.lane.b32.xlu1 %v2457_v21, %s4371_s15  ;;  %v1013_v21 = vrot.slane %v4106_v16, 1  ;;  %v1480_v61 = vor.u32 %v1479_v54, %v1475_v47  ;;  %v1587_v3 = vrot.slane %v1585_v62, 1  ;;  %v1913_v16 = vrot.slane %v4126_v12, 1  ;;  %v4128_v17 = vld [vmem:[%s4463_s8 + $0x24] sm:$0xfe]   ;;  %v4134_v40 = vld [vmem:[%s4463_s8 + $0x90] sm:$0xff]  }
  0x4f   : > { %2542 = vrot.lane.b32.xlu0 %v2361_v26, %s4371_s15  ;;  %v989_v26 = vrot.slane %v4108_v23, 1  ;;  %v1592_v7 = vrot.slane %v1590_v1, 1  ;;  %v4129_v20 = vld [vmem:[%s4463_s8 + $0x2c] ss:$0 sps:$4 sm:$0x11]   ;;  %v4138_v23 = vld [vmem:[%s4463_s8 + $0x90] sm:$0xff]  }
  0x50   : > { %v1015_v28 = vsel %vm982_vm0, %v1013_v21, %v1014_v22  ;;  %v1588_v10 = vor.u32 %v1587_v3, %v1583_v60  ;;  %v1889_v22 = vrot.slane %v4128_v17, 1  ;;  %v1890_v24 = vrot.slane %v4129_v20, 1  ;;  %v4135_v43 = vld [vmem:[%s4463_s8 + $0x30] sm:$0xff]   ;;  %v4141_v47 = vld [vmem:[%s4463_s8 + $0x38] ss:$0 sps:$4 sm:$0x11]  }
  0x51   : > { %v991_v32 = vsel %vm982_vm0, %v989_v26, %v990_v29  ;;  %v4131_v26 = vld [vmem:[%s4463_s8 + $0x98] ss:$0 sps:$4 sm:$0x11]   ;;  %v2471_v33 = vshrl.u32 %v4138_v23, 16  ;;  %v2473_v35 = vshll.u32 %v4138_v23, 16  ;;  %v4142_v49 = vld [vmem:[%s4463_s8 + $0x9c] sm:$0xff]  }
  0x52   : > { %2560 = vrot.lane.b32.xlu1 %v2469_v36, %s4371_s15  ;;  %v4113_v36 = vld [vmem:[%s4463_s8 + $0x2c] ss:$0 sps:$4 sm:$0x11]   ;;  %v1593_v18 = vsel %vm548_vm1, %v1588_v10, %v1592_v7  ;;  %v1917_v29 = vrot.slane %v4131_v26, 1  ;;  %v1891_v31 = vsel %vm982_vm0, %v1889_v22, %v1890_v24  ;;  %v2485_v55 = vshll.u32 %v4142_v49, 16  ;;  %v4150_v3 = vld [vmem:[%s4463_s8 + $0x90] sm:$0xff]  }
  0x53   : > { %2544 = vrot.lane.b32.xlu0 %v2373_v37, %s4371_s15  ;;  %v1571_v37 = vshrl.u32 %v4118_v27, 16  ;;  %v993_v41 = vrot.slane %v4113_v36, 1  ;;  %v4143_v54 = vld [vmem:[%s4463_s8 + $0xa4] ss:$0 sps:$4 sm:$0x11]   ;;  %v2483_v59 = vshrl.u32 %v4142_v49, 16 }
  0x54   : > { %v2490_v60 = vshll.u32 %v4143_v54, 16  ;;  %v4149_v20 = vld [vmem:[%s4463_s8 + $0x38] ss:$0 sps:$4 sm:$0x11]   ;;  %v4161_v49 = vld [vmem:[%s4463_s8 + $0x60] sm:$0xff]  }
  0x55   : > { %v994_v45 = vsel %vm982_vm0, %v992_v39, %v993_v41  ;;  %v1576_v56 = vor.u32 %v1575_v46, %v1571_v37  ;;  %v4140_v37 = vld [vmem:[%s4463_s8 + $0x30] sm:$0xff]   ;;  %v2475_v41 = vrot.slane %v2473_v35, 1  ;;  %v2790_v26 = vrot.slane %v4149_v20, 1  ;;  %364 = vst.msk [vmem:[#allocation2 + $0x40] sm:$0xff] %vm355_vm2, %v4161_v49  ;;  %v4180_v49 = vld [vmem:[%s4463_s8 + $0x3c] sm:$0xff]  }
  0x56   : > { %2847 = vrot.lane.b32.xlu1 %v2809_v44, %s4372_s16  ;;  %v4115_v44 = vld [vmem:[%s4463_s8 + $0x24] sm:$0xff]   ;;  %v4154_v35 = vld [vmem:[%s4463_s8 + $0xc] sm:$0xff]  }
  0x57   : > { %2831 = vrot.lane.b32.xlu0 %v2785_v48, %s4372_s16  ;;  %v4119_v48 = vld [vmem:[%s4463_s8 + $0x8c] ss:$0 sps:$4 sm:$0x11]   ;;  %357 = vst.msk [vmem:[#allocation2 + $0x8] sm:$0xff] %vm355_vm2, %v4154_v35 }
  0x58   : > { %v1578_v52 = vshll.u32 %v4119_v48, 16 }
  0x5a   : > { %761 = vrot.lane.b32.xlu1 %v680_v58, %s4367_s11  ;;  %v1580_v57 = vrot.slane %v1578_v52, 1  ;;  %v1482_v58 = vshll.u32 %v4121_v53, 16  ;;  %v2382_v53 = vshll.u32 %v4141_v47, 16  ;;  %v4160_v47 = vld [vmem:[%s4463_s8 + $0x6c] sm:$0xff]  }
  0x5b   : > { %745 = vrot.lane.b32.xlu0 %v584_v63, %s4367_s11  ;;  %v4124_v63 = vld [vmem:[%s4463_s8 + $0x30] sm:$0xff]   ;;  %365 = vst.msk [vmem:[#allocation2 + $0x48] sm:$0xff] %vm355_vm2, %v4160_v47  ;;  %v4178_v47 = vld [vmem:[%s4463_s8 + $0x9c] sm:$0xff]  }
  0x5c   : > { %v1484_v0 = vrot.slane %v1482_v58, 1  ;;  %v1487_v4 = vshrl.u32 %v4124_v63, 16  ;;  %v1581_v6 = vsel %vm548_vm1, %v1576_v56, %v1580_v57  ;;  %v4144_v56 = vld [vmem:[%s4463_s8 + $0x3c] sm:$0xff]   ;;  %v2476_v57 = vor.u32 %v2475_v41, %v2471_v33  ;;  %v4153_v33 = vld [vmem:[%s4463_s8 + $0x38] ss:$0 sps:$4 sm:$0x11]  }
  0x5d   : > { %v2384_v58 = vrot.slane %v2382_v53, 1  ;;  %v2387_v1 = vshrl.u32 %v4144_v56, 16  ;;  %v4155_v41 = vld [vmem:[%s4463_s8] sm:$0xff]  }
  0x5e   : > { %2849 = vrot.lane.b32.xlu1 %v2812_v5, %s4372_s16  ;;  %v1489_v5 = vshll.u32 %v4124_v63, 16  ;;  %v1485_v9 = vsel %vm548_vm1, %v1480_v61, %v1484_v0  ;;  %v4145_v61 = vld [vmem:[%s4463_s8 + $0x44] ss:$0 sps:$4 sm:$0x11]   ;;  %v2487_v0 = vrot.slane %v2485_v55, 1  ;;  %356 = vst.msk [vmem:[#allocation2] sm:$0xff] %vm355_vm2, %v4155_v41 }
  0x5f   : > { %2833 = vrot.lane.b32.xlu0 %v2788_v8, %s4372_s16  ;;  %v1494_v8 = vshll.u32 %v4125_v2, 16  ;;  %v2389_v2 = vshll.u32 %v4144_v56, 16  ;;  %v4158_v55 = vld [vmem:[%s4463_s8 + $0x3c] sm:$0xfe]  }
  0x60   : > { %v1491_v11 = vrot.slane %v1489_v5, 1  ;;  %v2394_v5 = vshll.u32 %v4145_v61, 16  ;;  %v2488_v12 = vor.u32 %v2487_v0, %v2483_v59  ;;  %v4159_v56 = vld [vmem:[%s4463_s8 + $0x44] ss:$0 sps:$4 sm:$0x11]  }
  0x61   : > { %v1496_v14 = vrot.slane %v1494_v8, 1  ;;  %v2391_v7 = vrot.slane %v2389_v2, 1  ;;  %v4146_v8 = vld [vmem:[%s4463_s8 + $0x90] sm:$0xfe]   ;;  %v2793_v59 = vrot.slane %v4159_v56, 1  ;;  %v1499_v56 = vshrl.u32 %v4180_v49, 16 }
  0x62   : > { %763 = vrot.lane.b32.xlu1 %v692_v19, %s4367_s11  ;;  %v1492_v15 = vor.u32 %v1491_v11, %v1487_v4  ;;  %v1914_v19 = vrot.slane %v4127_v13, 1  ;;  %v2492_v4 = vrot.slane %v2490_v60, 1  ;;  %v2396_v13 = vrot.slane %v2394_v5, 1  ;;  %v4163_v2 = vld [vmem:[%s4463_s8 + $0xa4] ss:$0 sps:$4 sm:$0x11]  }
  0x63   : > { %747 = vrot.lane.b32.xlu0 %v596_v25, %s4367_s11  ;;  %v4130_v25 = vld [vmem:[%s4463_s8 + $0x90] sm:$0xfe]   ;;  %v2813_v17 = vrot.slane %v4146_v8, 1  ;;  %v713_v5 = vshll.u32 %v4163_v2, 16 }
  0x64   : > { %v1497_v21 = vsel %vm548_vm1, %v1492_v15, %v1496_v14  ;;  %v1915_v27 = vsel %vm982_vm0, %v1913_v16, %v1914_v19  ;;  %v694_v14 = vshrl.u32 %v4150_v3, 16  ;;  %v2392_v16 = vor.u32 %v2391_v7, %v2387_v1  ;;  %v4148_v19 = vld [vmem:[%s4463_s8 + $0x30] sm:$0xfe]  }
  0x65   : > { %v2789_v23 = vrot.slane %v4148_v19, 1 }
  0x66   : > { %1051 = vrot.lane.b32.xlu1 %v1015_v28, %s4366_s10  ;;  %v1916_v28 = vrot.slane %v4130_v25, 1  ;;  %v2493_v25 = vsel %vm548_vm1, %v2488_v12, %v2492_v4  ;;  %v2397_v30 = vsel %vm548_vm1, %v2392_v16, %v2396_v13  ;;  %v715_v12 = vrot.slane %v713_v5, 1 }
  0x67   : > { %1035 = vrot.lane.b32.xlu0 %v991_v32, %s4366_s10  ;;  %v4133_v32 = vld [vmem:[%s4463_s8 + $0x38] ss:$0 sps:$4 sm:$0x11]  }
  0x68   : > { %v1893_v36 = vrot.slane %v4133_v32, 1 }
  0x6a   : > { %1053 = vrot.lane.b32.xlu1 %v1018_v38, %s4366_s10  ;;  %v1918_v38 = vsel %vm982_vm0, %v1916_v28, %v1917_v29  ;;  %v1894_v39 = vsel %vm982_vm0, %v1892_v34, %v1893_v36 }
  0x6b   : > { %1037 = vrot.lane.b32.xlu0 %v994_v45, %s4366_s10  ;;  %v2377_v45 = vshll.u32 %v4140_v37, 16 }
  0x6d   : > { %v2379_v48 = vrot.slane %v2377_v45, 1 }
  0x6e   : > { %1229 = vrot.lane.b32.xlu1 %v4114_v42, %s4365_s9  ;;  %v2375_v42 = vshrl.u32 %v4140_v37, 16 }
  0x6f   : > { %1213 = vrot.lane.b32.xlu0 %v4115_v44, %s4365_s9  ;;  %v4139_v44 = vld [vmem:[%s4463_s8 + $0x98] ss:$0 sps:$4 sm:$0x11]  }
  0x70   : > { %v2478_v46 = vshll.u32 %v4139_v44, 16  ;;  %v2380_v62 = vor.u32 %v2379_v48, %v2375_v42  ;;  %v2791_v42 = vsel %vm982_vm0, %v2789_v23, %v2790_v26  ;;  %v4157_v48 = vld [vmem:[%s4463_s8 + $0xa4] ss:$0 sps:$4 sm:$0x11]   ;;  %v4168_v23 = vld [vmem:[%s4463_s8 + $0x30] sm:$0xfe]  }
  0x71   : > { %v2817_v54 = vrot.slane %v4157_v48, 1  ;;  %v4179_v48 = vld [vmem:[%s4463_s8 + $0xa4] ss:$0 sps:$4 sm:$0x11]  }
  0x72   : > { %1231 = vrot.lane.b32.xlu1 %v4116_v50, %s4365_s9  ;;  %v4136_v50 = vld [vmem:[%s4463_s8 + $0x9c] sm:$0xff]   ;;  %v2480_v52 = vrot.slane %v2478_v46, 1  ;;  %v2385_v15 = vsel %vm548_vm1, %v2380_v62, %v2384_v58  ;;  %v2792_v58 = vrot.slane %v4158_v55, 1 }
  0x73   : > { %1215 = vrot.lane.b32.xlu0 %v4117_v51, %s4365_s9  ;;  %v4137_v51 = vld [vmem:[%s4463_s8 + $0x3c] sm:$0xff]  }
  0x74   : > { %v2481_v10 = vsel %vm548_vm1, %v2476_v57, %v2480_v52  ;;  %v4156_v46 = vld [vmem:[%s4463_s8 + $0x9c] sm:$0xfe]   ;;  %v2794_v1 = vsel %vm982_vm0, %v2792_v58, %v2793_v59 }
  0x75   : > { %v4162_v52 = vld [vmem:[%s4463_s8 + $0x9c] sm:$0xff]  }
  0x76   : > { %1662 = vrot.lane.b32.xlu1 %v1581_v6, %s4368_s12  ;;  %v4152_v6 = vld [vmem:[%s4463_s8 + $0x30] sm:$0xff]   ;;  %v706_v62 = vshrl.u32 %v4162_v52, 16  ;;  %v708_v0 = vshll.u32 %v4162_v52, 16  ;;  %v1597_v52 = vshll.u32 %v4178_v47, 16 }
  0x77   : > { %1646 = vrot.lane.b32.xlu0 %v1485_v9, %s4368_s12  ;;  %v4147_v9 = vld [vmem:[%s4463_s8 + $0x98] ss:$0 sps:$4 sm:$0x11]   ;;  %v598_v24 = vshrl.u32 %v4152_v6, 16  ;;  %v600_v29 = vshll.u32 %v4152_v6, 16 }
  0x78   : > { %v710_v4 = vrot.slane %v708_v0, 1  ;;  %v4165_v6 = vld [vmem:[%s4463_s8 + $0x44] ss:$0 sps:$4 sm:$0x11]   ;;  %v1599_v59 = vrot.slane %v1597_v52, 1  ;;  %v4195_v52 = vld [vmem:[%s4463_s8 + $0x48] sm:$0xff]  }
  0x79   : > { %v602_v34 = vrot.slane %v600_v29, 1 }
  0x7a   : > { %1664 = vrot.lane.b32.xlu1 %v1593_v18, %s4368_s12  ;;  %v2814_v18 = vrot.slane %v4147_v9, 1  ;;  %v711_v9 = vor.u32 %v710_v4, %v706_v62  ;;  %v4182_v62 = vld [vmem:[%s4463_s8 + $0xa8] sm:$0xff]  }
  0x7b   : > { %1648 = vrot.lane.b32.xlu0 %v1497_v21, %s4368_s12  ;;  %v696_v21 = vshll.u32 %v4150_v3, 16  ;;  %v4164_v3 = vld [vmem:[%s4463_s8 + $0x3c] sm:$0xff]   ;;  %v1607_v4 = vshrl.u32 %v4182_v62, 16  ;;  %v1609_v5 = vshll.u32 %v4182_v62, 16 }
  0x7c   : > { %v2815_v36 = vsel %vm982_vm0, %v2813_v17, %v2814_v18  ;;  %v610_v7 = vshrl.u32 %v4164_v3, 16  ;;  %v612_v8 = vshll.u32 %v4164_v3, 16  ;;  %v4167_v17 = vld [vmem:[%s4463_s8 + $0x98] ss:$0 sps:$4 sm:$0x11]  }
  0x7d   : > { %v698_v28 = vrot.slane %v696_v21, 1  ;;  %v1020_v21 = vrot.slane %v4167_v17, 1 }
  0x7e   : > { %1951 = vrot.lane.b32.xlu1 %v1915_v27, %s4369_s13  ;;  %v4151_v27 = vld [vmem:[%s4463_s8 + $0x98] ss:$0 sps:$4 sm:$0x11]   ;;  %v614_v13 = vrot.slane %v612_v8, 1 }
  0x7f   : > { %1935 = vrot.lane.b32.xlu0 %v1891_v31, %s4369_s13  ;;  %v701_v32 = vshll.u32 %v4151_v27, 16 }
  0x80   : > { %v615_v18 = vor.u32 %v614_v13, %v610_v7 }
  0x82   : > { %1953 = vrot.lane.b32.xlu1 %v1918_v38, %s4369_s13  ;;  %v699_v38 = vor.u32 %v698_v28, %v694_v14  ;;  %v617_v14 = vshll.u32 %v4165_v6, 16  ;;  %v995_v28 = vrot.slane %v4168_v23, 1  ;;  %v4184_v6 = vld [vmem:[%s4463_s8 + $0x48] sm:$0xff]   ;;  %v4187_v23 = vld [vmem:[%s4463_s8 + $0xa4] ss:$0 sps:$4 sm:$0x11]  }
  0x83   : > { %1937 = vrot.lane.b32.xlu0 %v1894_v39, %s4369_s13  ;;  %v703_v39 = vrot.slane %v701_v32, 1 }
  0x84   : > { %v619_v19 = vrot.slane %v617_v14, 1  ;;  %v1611_v14 = vrot.slane %v1609_v5, 1 }
  0x86   : > { %2129 = vrot.lane.b32.xlu1 %v4134_v40, %s4370_s14  ;;  %v605_v40 = vshll.u32 %v4153_v33, 16  ;;  %v4172_v33 = vld [vmem:[%s4463_s8 + $0x3c] sm:$0xfe]  }
  0x87   : > { %2113 = vrot.lane.b32.xlu0 %v4135_v43, %s4370_s14  ;;  %v603_v43 = vor.u32 %v602_v34, %v598_v24  ;;  %v4169_v24 = vld [vmem:[%s4463_s8 + $0x38] ss:$0 sps:$4 sm:$0x11]  }
  0x88   : > { %v607_v45 = vrot.slane %v605_v40, 1  ;;  %v996_v29 = vrot.slane %v4169_v24, 1 }
  0x8a   : > { %2131 = vrot.lane.b32.xlu1 %v4136_v50, %s4370_s14  ;;  %v704_v50 = vsel %vm548_vm1, %v699_v38, %v703_v39  ;;  %v608_v53 = vsel %vm548_vm1, %v603_v43, %v607_v45  ;;  %v998_v38 = vrot.slane %v4172_v33, 1  ;;  %v4174_v39 = vld [vmem:[%s4463_s8 + $0x9c] sm:$0xff]  }
  0x8b   : > { %2115 = vrot.lane.b32.xlu0 %v4137_v51, %s4370_s14  ;;  %v2816_v51 = vrot.slane %v4156_v46, 1  ;;  %v4176_v46 = vld [vmem:[%s4463_s8 + $0xa8] sm:$0xff]  }
  0x8d   : > { %v2818_v61 = vsel %vm982_vm0, %v2816_v51, %v2817_v54  ;;  %v1595_v51 = vshrl.u32 %v4178_v47, 16  ;;  %v4181_v54 = vld [vmem:[%s4463_s8 + $0x44] ss:$0 sps:$4 sm:$0x11]  }
  0x8e   : > { %2562 = vrot.lane.b32.xlu1 %v2481_v10, %s4371_s15 }
  0x8f   : > { %2546 = vrot.lane.b32.xlu0 %v2385_v15, %s4371_s15  ;;  %v4166_v15 = vld [vmem:[%s4463_s8 + $0x90] sm:$0xfe]   ;;  %v1600_v2 = vor.u32 %v1599_v59, %v1595_v51  ;;  %v4202_v59 = vld [vmem:[%s4463_s8 + $0xb0] ss:$0 sps:$4 sm:$0x11]  }
  0x90   : > { %v4663_v63 = vpop.permute.xlu1 %1225  ;;  %v1019_v20 = vrot.slane %v4166_v15, 1  ;;  %v1511_v15 = vshrl.u32 %v4184_v6, 16 }
  0x91   : > { %v4672_v11 = vpop.permute.xlu0 %1209 }
  0x92   : > { %2564 = vrot.lane.b32.xlu1 %v2493_v25, %s4371_s15  ;;  %v620_v25 = vsel %vm548_vm1, %v615_v18, %v619_v19  ;;  %v1612_v19 = vor.u32 %v1611_v14, %v1607_v4 }
  0x93   : > { %2548 = vrot.lane.b32.xlu0 %v2397_v30, %s4371_s15  ;;  %v4170_v30 = vld [vmem:[%s4463_s8 + $0x9c] sm:$0xfe]  }
  0x94   : > { %v4678_v22 = vpop.permute.xlu1 %1047  ;;  %v1022_v32 = vrot.slane %v4170_v30, 1  ;;  %v4188_v30 = vld [vmem:[%s4463_s8 + $0x3c] sm:$0xfe]  }
  0x95   : > { %v1032_v31 = vpop.permute.xlu0 %1031 }
  0x96   : > { %2851 = vrot.lane.b32.xlu1 %v2815_v36, %s4372_s16  ;;  %v4173_v36 = vld [vmem:[%s4463_s8 + $0x44] ss:$0 sps:$4 sm:$0x11]  }
  0x97   : > { %2835 = vrot.lane.b32.xlu0 %v2791_v42, %s4372_s16  ;;  %v999_v41 = vrot.slane %v4173_v36, 1  ;;  %v4175_v42 = vld [vmem:[%s4463_s8 + $0x3c] sm:$0xff]   ;;  %v4190_v36 = vld [vmem:[%s4463_s8 + $0xa8] sm:$0xfe]  }
  0x98   : > { %v1050_v37 = vpop.permute.xlu1 %1049 }
  0x99   : > { %v1034_v44 = vpop.permute.xlu0 %1033  ;;  %v1000_v43 = vsel %vm982_vm0, %v998_v38, %v999_v41 }
  0x9a   : > { %765 = vrot.lane.b32.xlu1 %v704_v50, %s4367_s11  ;;  %v4177_v50 = vld [vmem:[%s4463_s8 + $0x48] sm:$0xff]  }
  0x9b   : > { %749 = vrot.lane.b32.xlu0 %v608_v53, %s4367_s11  ;;  %v1602_v53 = vshll.u32 %v4179_v48, 16 }
  0x9c   : > { %v744_v57 = vpop.permute.xlu1 %743 }
  0x9d   : > { %791 = vst.msk [vmem:[#allocation2 + $0x8] sm:$0xff] %vm789_vm3, %v744_v57  ;;  %v742_v60 = vpop.permute.xlu0 %741  ;;  %v1501_v57 = vshll.u32 %v4180_v49, 16  ;;  %v4194_v49 = vld [vmem:[%s4463_s8 + $0xa8] sm:$0xff]  }
  0x9e   : > { %1081 = vst.msk [vmem:[#allocation2 + $0x8] sm:$0xff] %vm1079_vm4, %v1034_v44  ;;  %2853 = vrot.lane.b32.xlu1 %v2818_v61, %s4372_s16  ;;  %v1506_v61 = vshll.u32 %v4181_v54, 16  ;;  %v4199_v54 = vld [vmem:[%s4463_s8 + $0x18] sm:$0xff]  }
  0x9f   : > { %790 = vst.msk [vmem:[#allocation2] sm:$0xff] %vm789_vm3, %v742_v60  ;;  %2837 = vrot.lane.b32.xlu0 %v2794_v1, %s4372_s16  ;;  %v1604_v60 = vrot.slane %v1602_v53, 1  ;;  %v1503_v0 = vrot.slane %v1501_v57, 1  ;;  %v4183_v1 = vld [vmem:[%s4463_s8 + $0xb0] ss:$0 sps:$4 sm:$0x11]  }
  0xa0   : > { %1080 = vst.msk [vmem:[#allocation2] sm:$0xff] %vm1079_vm4, %v1032_v31  ;;  %v760_v10 = vpop.permute.xlu1 %759  ;;  %v4171_v31 = vld [vmem:[%s4463_s8 + $0xa4] ss:$0 sps:$4 sm:$0x11]   ;;  %v1508_v3 = vrot.slane %v1506_v61, 1  ;;  %v4196_v57 = vld [vmem:[%s4463_s8 + $0xb4] sm:$0xff]  }
  0xa1   : > { %1258 = vst.msk [vmem:[#allocation2] sm:$0xff] %vm1257_vm5, %v4672_v11  ;;  %v758_v16 = vpop.permute.xlu0 %757  ;;  %v716_v11 = vsel %vm548_vm1, %v711_v9, %v715_v12  ;;  %v1023_v35 = vrot.slane %v4171_v31, 1  ;;  %v1504_v8 = vor.u32 %v1503_v0, %v1499_v56  ;;  %v1614_v9 = vshll.u32 %v4183_v1, 16  ;;  %v4189_v31 = vld [vmem:[%s4463_s8 + $0x44] ss:$0 sps:$4 sm:$0x11]  }
  0xa2   : > { %799 = vst.msk [vmem:[#allocation2 + $0x48] sm:$0xff] %vm789_vm3, %v760_v10  ;;  %798 = vst.msk [vmem:[#allocation2 + $0x40] sm:$0xff] %vm789_vm3, %v758_v16  ;;  %767 = vrot.lane.b32.xlu1 %v716_v11, %s4367_s11  ;;  %v4185_v10 = vld [vmem:[%s4463_s8 + $0x50] ss:$0 sps:$4 sm:$0x11]   ;;  %v1605_v13 = vsel %vm548_vm1, %v1600_v2, %v1604_v60  ;;  %v1513_v16 = vshll.u32 %v4184_v6, 16 }
  0xa3   : > { %1089 = vst.msk [vmem:[#allocation2 + $0x48] sm:$0xff] %vm1079_vm4, %v1050_v37  ;;  %1088 = vst.msk [vmem:[#allocation2 + $0x40] sm:$0xff] %vm1079_vm4, %v4678_v22  ;;  %751 = vrot.lane.b32.xlu0 %v620_v25, %s4367_s11  ;;  %v1021_v22 = vsel %vm982_vm0, %v1019_v20, %v1020_v21  ;;  %v1024_v40 = vsel %vm982_vm0, %v1022_v32, %v1023_v35  ;;  %v1509_v17 = vsel %vm548_vm1, %v1504_v8, %v1508_v3  ;;  %v4186_v21 = vld [vmem:[%s4463_s8 + $0x9c] sm:$0xfe]   ;;  %v4203_v60 = vld [vmem:[%s4463_s8 + $0x48] sm:$0xff]  }
  0xa4   : > { %v1228_v26 = vpop.permute.xlu1 %1227  ;;  %1266 = vst.msk [vmem:[#allocation2 + $0x40] sm:$0xff] %vm1257_vm5, %v4663_v63  ;;  %v997_v63 = vsel %vm982_vm0, %v995_v28, %v996_v29  ;;  %v1616_v11 = vrot.slane %v1614_v9, 1  ;;  %v1518_v18 = vshll.u32 %v4185_v10, 16  ;;  %v1515_v20 = vrot.slane %v1513_v16, 1  ;;  %v4197_v61 = vld [vmem:[%s4463_s8 + $0x54] sm:$0xff]   ;;  %v4205_v8 = vld [vmem:[%s5309_s1 + $0x8] sm:$0xff]  }
  0xa5   : > { %1267 = vst.msk [vmem:[#allocation2 + $0x48] sm:$0xff] %vm1257_vm5, %v1228_v26  ;;  %v1212_v27 = vpop.permute.xlu0 %1211  ;;  %v1919_v28 = vrot.slane %v4186_v21, 1  ;;  %v1920_v29 = vrot.slane %v4187_v23, 1  ;;  %v1895_v32 = vrot.slane %v4188_v30, 1  ;;  %v1896_v35 = vrot.slane %v4189_v31, 1  ;;  %v4208_v16 = vld [vmem:[%s4463_s8 + $0x54] sm:$0xff]  }
  0xa6   : > { %1259 = vst.msk [vmem:[#allocation2 + $0x8] sm:$0xff] %vm1257_vm5, %v1212_v27  ;;  %1055 = vrot.lane.b32.xlu1 %v1021_v22, %s4366_s10  ;;  %v1520_v25 = vrot.slane %v1518_v18, 1  ;;  %v1617_v27 = vsel %vm548_vm1, %v1612_v19, %v1616_v11  ;;  %v1516_v22 = vor.u32 %v1515_v20, %v1511_v15  ;;  %v2502_v2 = vshll.u32 %v4202_v59, 16  ;;  %v4204_v3 = vld [vmem:[%s4463_s8 + $0x50] ss:$0 sps:$4 sm:$0x11]  }
  0xa7   : > { %1039 = vrot.lane.b32.xlu0 %v997_v63, %s4366_s10  ;;  %358 = vst.msk [vmem:[#allocation2 + $0x10] sm:$0xff] %vm355_vm2, %v4199_v54  ;;  %v2399_v4 = vshrl.u32 %v4203_v60, 16  ;;  %v2401_v5 = vshll.u32 %v4203_v60, 16  ;;  %v4207_v15 = vld [vmem:[%s4463_s8 + $0xbc] ss:$0 sps:$4 sm:$0x11]  }
  0xa8   : > { %v1659_v34 = vpop.permute.xlu1 %1658  ;;  %v1521_v63 = vsel %vm548_vm1, %v1516_v22, %v1520_v25  ;;  %v2504_v9 = vrot.slane %v2502_v2, 1  ;;  %v4210_v21 = vld [vmem:[%s4463_s8 + $0x84] sm:$0xff]   ;;  %v2514_v25 = vshll.u32 %v4207_v15, 16 }
  0xa9   : > { %1699 = vst.msk [vmem:[#allocation2 + $0x40] sm:$0xff] %vm1690_vm6, %v1659_v34  ;;  %v1643_v37 = vpop.permute.xlu0 %1642  ;;  %v1921_v34 = vsel %vm982_vm0, %v1919_v28, %v1920_v29  ;;  %v2403_v10 = vrot.slane %v2401_v5, 1  ;;  %v2411_v28 = vshrl.u32 %v4208_v16, 16  ;;  %v2413_v29 = vshll.u32 %v4208_v16, 16  ;;  %v4211_v30 = vld [vmem:[%s4463_s8 + $0x24] sm:$0xff]   ;;  %v4225_v5 = vld [vmem:[%s4463_s8 + $0xb4] sm:$0xff]  }
  0xaa   : > { %1691 = vst.msk [vmem:[#allocation2] sm:$0xff] %vm1690_vm6, %v1643_v37  ;;  %1057 = vrot.lane.b32.xlu1 %v1024_v40, %s4366_s10  ;;  %v4191_v37 = vld [vmem:[%s4463_s8 + $0xb0] ss:$0 sps:$4 sm:$0x11]   ;;  %v1922_v40 = vrot.slane %v4190_v36, 1  ;;  %v2516_v31 = vrot.slane %v2514_v25, 1 }
  0xab   : > { %1041 = vrot.lane.b32.xlu0 %v1000_v43, %s4366_s10  ;;  %v1923_v41 = vrot.slane %v4191_v37, 1  ;;  %v4193_v43 = vld [vmem:[%s4463_s8 + $0x50] ss:$0 sps:$4 sm:$0x11]   ;;  %v2404_v11 = vor.u32 %v2403_v10, %v2399_v4  ;;  %367 = vst.msk [vmem:[#allocation2 + $0x58] sm:$0xff] %vm355_vm2, %v4210_v21  ;;  %359 = vst.msk [vmem:[#allocation2 + $0x18] sm:$0xff] %vm355_vm2, %v4211_v30 }
  0xac   : > { %v1661_v44 = vpop.permute.xlu1 %1660  ;;  %v1899_v48 = vrot.slane %v4193_v43, 1  ;;  %v4213_v43 = vld [vmem:[%s4463_s8 + $0xa8] sm:$0xfe]   ;;  %v4220_v4 = vld [vmem:[%s4463_s8 + $0x50] ss:$0 sps:$4 sm:$0x11]  }
  0xad   : > { %1700 = vst.msk [vmem:[#allocation2 + $0x48] sm:$0xff] %vm1690_vm6, %v1661_v44  ;;  %v1645_v45 = vpop.permute.xlu0 %1644  ;;  %v629_v10 = vshll.u32 %v4220_v4, 16  ;;  %v4224_v25 = vld [vmem:[%s4463_s8 + $0x5c] ss:$0 sps:$4 sm:$0x11]  }
  0xae   : > { %1692 = vst.msk [vmem:[#allocation2 + $0x8] sm:$0xff] %vm1690_vm6, %v1645_v45  ;;  %1233 = vrot.lane.b32.xlu1 %v4174_v39, %s4365_s9  ;;  %v1897_v39 = vsel %vm982_vm0, %v1895_v32, %v1896_v35  ;;  %v1924_v45 = vsel %vm982_vm0, %v1922_v40, %v1923_v41  ;;  %v2415_v35 = vrot.slane %v2413_v29, 1  ;;  %v4217_v40 = vld [vmem:[%s4463_s8 + $0xa8] sm:$0xff]   ;;  %v2799_v29 = vrot.slane %v4224_v25, 1  ;;  %v4240_v25 = vld [vmem:[%s4463_s8 + $0x60] sm:$0xff]  }
  0xaf   : > { %1217 = vrot.lane.b32.xlu0 %v4175_v42, %s4365_s9  ;;  %v4192_v42 = vld [vmem:[%s4463_s8 + $0x48] sm:$0xfe]  }
  0xb0   : > { %v1948_v55 = vpop.permute.xlu1 %1947 }
  0xb1   : > { %1988 = vst.msk [vmem:[#allocation2 + $0x40] sm:$0xff] %vm1979_vm7, %v1948_v55  ;;  %v1932_v58 = vpop.permute.xlu0 %1931  ;;  %v4200_v55 = vld [vmem:[%s5309_s1] sm:$0xff]  }
  0xb2   : > { %1980 = vst.msk [vmem:[#allocation2] sm:$0xff] %vm1979_vm7, %v1932_v58  ;;  %1235 = vrot.lane.b32.xlu1 %v4176_v46, %s4365_s9  ;;  %v1898_v46 = vrot.slane %v4192_v42, 1  ;;  %v4201_v58 = vld [vmem:[%s4463_s8 + $0xa8] sm:$0xff]   ;;  %3931 = vmatprep.subr.bf16.mxu0 %v4200_v55  ;;  %v2416_v42 = vor.u32 %v2415_v35, %v2411_v28  ;;  %v4228_v35 = vld [vmem:[%s4463_s8 + $0x5c] ss:$0 sps:$4 sm:$0x11]  }
  0xb3   : > { %1219 = vrot.lane.b32.xlu0 %v4177_v50, %s4365_s9  ;;  %v4198_v50 = vld [vmem:[%s4463_s8 + $0x78] sm:$0xff]   ;;  %3969 = vmatprep.subr.bf16.mxu1 %v4200_v55  ;;  %v2495_v62 = vshrl.u32 %v4201_v58, 16  ;;  %v2497_v0 = vshll.u32 %v4201_v58, 16  ;;  %v720_v58 = vshll.u32 %v4217_v40, 16 }
  0xb4   : > { %v1950_v7 = vpop.permute.xlu1 %1949  ;;  %v1900_v51 = vsel %vm982_vm0, %v1898_v46, %v1899_v48  ;;  %366 = vst.msk [vmem:[#allocation2 + $0x50] sm:$0xff] %vm355_vm2, %v4198_v50  ;;  %3932 = vmatpush3.bf16.msra.mxu0 %v4200_v55  ;;  %3972 = vmatpush3.bf16.msra.mxu1 %v4200_v55  ;;  %v2819_v48 = vrot.slane %v4213_v43, 1 }
  0xb5   : > { %1989 = vst.msk [vmem:[#allocation2 + $0x48] sm:$0xff] %vm1979_vm7, %v1950_v7  ;;  %v1934_v12 = vpop.permute.xlu0 %1933  ;;  %v2499_v7 = vrot.slane %v2497_v0, 1  ;;  %3933 = vmatprep.subr.bf16.mxu0 %v4205_v8  ;;  %3970 = vmatprep.subr.bf16.mxu1 %v4205_v8 }
  0xb6   : > { %1981 = vst.msk [vmem:[#allocation2 + $0x8] sm:$0xff] %vm1979_vm7, %v1934_v12  ;;  %1666 = vrot.lane.b32.xlu1 %v1605_v13, %s4368_s12  ;;  %v2406_v12 = vshll.u32 %v4204_v3, 16  ;;  %v4206_v13 = vld [vmem:[%s4463_s8 + $0xb4] sm:$0xff]   ;;  %v4219_v3 = vld [vmem:[%s4463_s8 + $0x48] sm:$0xff]  }
  0xb7   : > { %1650 = vrot.lane.b32.xlu0 %v1509_v17, %s4368_s12  ;;  %v2500_v14 = vor.u32 %v2499_v7, %v2495_v62  ;;  %v2507_v19 = vshrl.u32 %v4206_v13, 16  ;;  %v2509_v20 = vshll.u32 %v4206_v13, 16  ;;  %v4221_v13 = vld [vmem:[%s4463_s8 + $0xb4] sm:$0xfe]  }
  0xb8   : > { %v2126_v24 = vpop.permute.xlu1 %2125  ;;  %v2408_v18 = vrot.slane %v2406_v12, 1  ;;  %3934 = vmatpush3.bf16.msra.mxu0 %v4205_v8  ;;  %3973 = vmatpush3.bf16.msra.mxu1 %v4205_v8  ;;  %v622_v8 = vshrl.u32 %v4219_v3, 16 }
  0xb9   : > { %2166 = vst.msk [vmem:[#allocation2 + $0x40] sm:$0xff] %vm2157_vm8, %v2126_v24  ;;  %v2110_v26 = vpop.permute.xlu0 %2109  ;;  %v2505_v24 = vsel %vm548_vm1, %v2500_v14, %v2504_v9  ;;  %v2511_v22 = vrot.slane %v2509_v20, 1  ;;  %v624_v9 = vshll.u32 %v4219_v3, 16  ;;  %v730_v14 = vshrl.u32 %v4225_v5, 16  ;;  %v4227_v20 = vld [vmem:[%s4463_s8 + $0x54] sm:$0xff]  }
  0xba   : > { %2158 = vst.msk [vmem:[#allocation2] sm:$0xff] %vm2157_vm8, %v2110_v26  ;;  %1668 = vrot.lane.b32.xlu1 %v1617_v27, %s4368_s12  ;;  %v4209_v26 = vld [vmem:[%s4463_s8 + $0x5c] ss:$0 sps:$4 sm:$0x11]   ;;  %v2409_v27 = vsel %vm548_vm1, %v2404_v11, %v2408_v18  ;;  %v631_v18 = vrot.slane %v629_v10, 1 }
  0xbb   : > { %1652 = vrot.lane.b32.xlu0 %v1521_v63, %s4368_s12  ;;  %v2418_v63 = vshll.u32 %v4209_v26, 16  ;;  %v626_v16 = vrot.slane %v624_v9, 1  ;;  %v4222_v11 = vld [vmem:[%s4463_s8 + $0xbc] ss:$0 sps:$4 sm:$0x11]   ;;  %v4241_v9 = vld [vmem:[%s4463_s8 + $0xb4] sm:$0xff]  }
  0xbc   : > { %v2128_v33 = vpop.permute.xlu1 %2127  ;;  %v4236_v3 = vld [vmem:[%s4463_s8 + $0x5c] ss:$0 sps:$4 sm:$0x11]  }
  0xbd   : > { %2167 = vst.msk [vmem:[#allocation2 + $0x48] sm:$0xff] %vm2157_vm8, %v2128_v33  ;;  %v2112_v38 = vpop.permute.xlu0 %2111  ;;  %v627_v21 = vor.u32 %v626_v16, %v622_v8  ;;  %v4237_v8 = vld [vmem:[%s4463_s8 + $0xb4] sm:$0xff]   ;;  %v1619_v16 = vshrl.u32 %v4241_v9, 16 }
  0xbe   : > { %2159 = vst.msk [vmem:[#allocation2 + $0x8] sm:$0xff] %vm2157_vm8, %v2112_v38  ;;  %1955 = vrot.lane.b32.xlu1 %v1921_v34, %s4369_s13  ;;  %v2512_v34 = vor.u32 %v2511_v22, %v2507_v19  ;;  %v2420_v38 = vrot.slane %v2418_v63, 1  ;;  %v2822_v19 = vrot.slane %v4221_v13, 1  ;;  %v732_v63 = vshll.u32 %v4225_v5, 16  ;;  %v4238_v13 = vld [vmem:[%s4463_s8 + $0x54] sm:$0xff]  }
  0xbf   : > { %1939 = vrot.lane.b32.xlu0 %v1897_v39, %s4369_s13  ;;  %v4212_v39 = vld [vmem:[%s5309_s1 + $0x10] ss:$0 sps:$4 sm:$0x33]  }
  0xc0   : > { %v2559_v44 = vpop.permute.xlu1 %2558  ;;  %v2517_v41 = vsel %vm548_vm1, %v2512_v34, %v2516_v31  ;;  %3975 = vmatprep.subr.msk.bf16.mxu0 %vm2988_vm12, %v4212_v39  ;;  %v2421_v46 = vsel %vm548_vm1, %v2416_v42, %v2420_v38  ;;  %3976 = vmatprep.subr.msk.bf16.mxu1 %vm2988_vm12, %v4212_v39  ;;  %v4226_v31 = vld [vmem:[%s4463_s8 + $0xbc] ss:$0 sps:$4 sm:$0x11]   ;;  %v4229_v42 = vld [vmem:[%s4463_s8 + $0xa8] sm:$0xfe]  }
  0xc1   : > { %2599 = vst.msk [vmem:[#allocation2 + $0x40] sm:$0xff] %vm2590_vm9, %v2559_v44  ;;  %v2543_v47 = vpop.permute.xlu0 %2542  ;;  %v2990_v44 = vsel %vm2988_vm12, %v4212_v39, 0  ;;  %v737_v34 = vshll.u32 %v4226_v31, 16 }
  0xc2   : > { %2591 = vst.msk [vmem:[#allocation2] sm:$0xff] %vm2590_vm9, %v2543_v47  ;;  %1957 = vrot.lane.b32.xlu1 %v1924_v45, %s4369_s13  ;;  %v4214_v45 = vld [vmem:[%s4463_s8 + $0xb0] ss:$0 sps:$4 sm:$0x11]   ;;  %3936 = vmatpush3.bf16.msra.mxu0 %v2990_v44 }
  0xc3   : > { %1941 = vrot.lane.b32.xlu0 %v1900_v51, %s4369_s13  ;;  %3974 = vmatpush3.bf16.msra.mxu1 %v2990_v44  ;;  %v2820_v51 = vrot.slane %v4214_v45, 1  ;;  %v739_v39 = vrot.slane %v737_v34, 1  ;;  %v4230_v45 = vld [vmem:[%s4463_s8 + $0xb0] ss:$0 sps:$4 sm:$0x11]  }
  0xc4   : > { %v2561_v53 = vpop.permute.xlu1 %2560 }
  0xc5   : > { %2600 = vst.msk [vmem:[#allocation2 + $0x48] sm:$0xff] %vm2590_vm9, %v2561_v53  ;;  %v2545_v56 = vpop.permute.xlu0 %2544  ;;  %v4216_v53 = vld [vmem:[%s4463_s8 + $0x50] ss:$0 sps:$4 sm:$0x11]   ;;  %v2821_v54 = vsel %vm982_vm0, %v2819_v48, %v2820_v51  ;;  %v4231_v51 = vld [vmem:[%s4463_s8 + $0x48] sm:$0xfe]  }
  0xc6   : > { %2592 = vst.msk [vmem:[#allocation2 + $0x8] sm:$0xff] %vm2590_vm9, %v2545_v56  ;;  %2133 = vrot.lane.b32.xlu1 %v4194_v49, %s4370_s14  ;;  %v718_v49 = vshrl.u32 %v4217_v40, 16  ;;  %v2796_v56 = vrot.slane %v4216_v53, 1  ;;  %v641_v40 = vshll.u32 %v4228_v35, 16 }
  0xc7   : > { %2117 = vrot.lane.b32.xlu0 %v4195_v52, %s4370_s14  ;;  %v4215_v52 = vld [vmem:[%s4463_s8 + $0x48] sm:$0xfe]  }
  0xc8   : > { %v2848_v1 = vpop.permute.xlu1 %2847  ;;  %v2795_v55 = vrot.slane %v4215_v52, 1  ;;  %v4232_v52 = vld [vmem:[%s4463_s8 + $0x50] ss:$0 sps:$4 sm:$0x11]  }
  0xc9   : > { %2888 = vst.msk [vmem:[#allocation2 + $0x40] sm:$0xff] %vm2879_vm10, %v2848_v1  ;;  %v2832_v6 = vpop.permute.xlu0 %2831  ;;  %v722_v1 = vrot.slane %v720_v58, 1  ;;  %v1002_v58 = vrot.slane %v4232_v52, 1  ;;  %v4250_v52 = vld [vmem:[%s4463_s8 + $0xbc] ss:$0 sps:$4 sm:$0x11]  }
  0xca   : > { %2880 = vst.msk [vmem:[#allocation2] sm:$0xff] %vm2879_vm10, %v2832_v6  ;;  %2135 = vrot.lane.b32.xlu1 %v4196_v57, %s4370_s14  ;;  %v4218_v57 = vld [vmem:[%s4463_s8 + $0xb0] ss:$0 sps:$4 sm:$0x11]  }
  0xcb   : > { %2119 = vrot.lane.b32.xlu0 %v4197_v61, %s4370_s14  ;;  %v2797_v61 = vsel %vm982_vm0, %v2795_v55, %v2796_v56  ;;  %v725_v2 = vshll.u32 %v4218_v57, 16  ;;  %v723_v6 = vor.u32 %v722_v1, %v718_v49  ;;  %v1001_v57 = vrot.slane %v4231_v51, 1 }
  0xcc   : > { %v762_v17 = vpop.permute.xlu1 %761 }
  0xcd   : > { %800 = vst.msk [vmem:[#allocation2 + $0x50] sm:$0xff] %vm789_vm3, %v762_v17  ;;  %v746_v23 = vpop.permute.xlu0 %745  ;;  %v727_v7 = vrot.slane %v725_v2, 1 }
  0xce   : > { %792 = vst.msk [vmem:[#allocation2 + $0x10] sm:$0xff] %vm789_vm3, %v746_v23  ;;  %2566 = vrot.lane.b32.xlu1 %v2505_v24, %s4371_s15  ;;  %v2823_v23 = vrot.slane %v4222_v11, 1  ;;  %v4223_v24 = vld [vmem:[%s4463_s8 + $0x54] sm:$0xfe]  }
  0xcf   : > { %2550 = vrot.lane.b32.xlu0 %v2409_v27, %s4371_s15  ;;  %v728_v15 = vsel %vm548_vm1, %v723_v6, %v727_v7  ;;  %v632_v27 = vsel %vm548_vm1, %v627_v21, %v631_v18  ;;  %v2798_v28 = vrot.slane %v4223_v24, 1  ;;  %v1005_v7 = vrot.slane %v4236_v3, 1  ;;  %v4243_v11 = vld [vmem:[%s4463_s8 + $0x54] sm:$0xff]   ;;  %v4239_v18 = vld [vmem:[%s4463_s8 + $0xc0] sm:$0xff]  }
  0xd0   : > { %v2850_v32 = vpop.permute.xlu1 %2849  ;;  %v2904_v33 = vld [vmem:[#allocation2 + $0x40] sm:$0xff]  ;;  %v2824_v22 = vsel %vm982_vm0, %v2822_v19, %v2823_v23  ;;  %v4244_v23 = vld [vmem:[%s4463_s8 + $0x5c] ss:$0 sps:$4 sm:$0x11]   ;;  %v1523_v24 = vshrl.u32 %v4243_v11, 16 }
  0xd1   : > { %2889 = vst.msk [vmem:[#allocation2 + $0x48] sm:$0xff] %vm2879_vm10, %v2850_v32  ;;  %v2834_v36 = vpop.permute.xlu0 %2833  ;;  %v2896_v37 = vld [vmem:[#allocation2] sm:$0xff]  ;;  %3953 = vmatprep.mubr.msk.bf16.mxu1 %vm2939_vm11, %v2904_v33  ;;  %v634_v32 = vshrl.u32 %v4227_v20, 16  ;;  %v2800_v33 = vsel %vm982_vm0, %v2798_v28, %v2799_v29 }
  0xd2   : > { %2881 = vst.msk [vmem:[#allocation2 + $0x8] sm:$0xff] %vm2879_vm10, %v2834_v36  ;;  %3937 = vmatprep.mubr.msk.bf16.mxu0 %vm2939_vm11, %v2896_v37  ;;  %2568 = vrot.lane.b32.xlu1 %v2517_v41, %s4371_s15  ;;  %v734_v36 = vrot.slane %v732_v63, 1  ;;  %v636_v37 = vshll.u32 %v4227_v20, 16  ;;  %v4246_v63 = vld [vmem:[%s4463_s8 + $0xc8] ss:$0 sps:$4 sm:$0x11]  }
  0xd3   : > { %2552 = vrot.lane.b32.xlu0 %v2421_v46, %s4371_s15  ;;  %v643_v46 = vrot.slane %v641_v40, 1  ;;  %v1638_v40 = vshll.u32 %v4246_v63, 16 }
  0xd4   : > { %v764_v47 = vpop.permute.xlu1 %763  ;;  %v735_v43 = vor.u32 %v734_v36, %v730_v14  ;;  %v638_v44 = vrot.slane %v636_v37, 1  ;;  %v4247_v36 = vld [vmem:[%s4463_s8 + $0x60] sm:$0xff]  }
  0xd5   : > { %801 = vst.msk [vmem:[#allocation2 + $0x58] sm:$0xff] %vm789_vm3, %v764_v47  ;;  %v748_v50 = vpop.permute.xlu0 %747  ;;  %v1025_v47 = vrot.slane %v4229_v42, 1 }
  0xd6   : > { %793 = vst.msk [vmem:[#allocation2 + $0x18] sm:$0xff] %vm789_vm3, %v748_v50  ;;  %2855 = vrot.lane.b32.xlu1 %v2821_v54, %s4372_s16  ;;  %v740_v48 = vsel %vm548_vm1, %v735_v43, %v739_v39  ;;  %v639_v49 = vor.u32 %v638_v44, %v634_v32  ;;  %v1026_v50 = vrot.slane %v4230_v45, 1  ;;  %v1535_v43 = vshrl.u32 %v4247_v36, 16 }
  0xd7   : > { %2839 = vrot.lane.b32.xlu0 %v2797_v61, %s4372_s16  ;;  %v1003_v61 = vsel %vm982_vm0, %v1001_v57, %v1002_v58  ;;  %v1537_v44 = vshll.u32 %v4247_v36, 16  ;;  %v1926_v58 = vrot.slane %v4250_v52, 1  ;;  %v4267_v36 = vld [vmem:[%s4463_s8 + $0xcc] sm:$0xff]  }
  0xd8   : > { %v1052_v59 = vpop.permute.xlu1 %1051  ;;  %v2905_v60 = vld [vmem:[#allocation2 + $0x48] sm:$0xff]  ;;  %v644_v55 = vsel %vm548_vm1, %v639_v49, %v643_v46  ;;  %v1027_v56 = vsel %vm982_vm0, %v1025_v47, %v1026_v50  ;;  %v1640_v46 = vrot.slane %v1638_v40, 1 }
  0xd9   : > { %1090 = vst.msk [vmem:[#allocation2 + $0x50] sm:$0xff] %vm1079_vm4, %v1052_v59  ;;  %v1036_v62 = vpop.permute.xlu0 %1035  ;;  %v2897_v0 = vld [vmem:[#allocation2 + $0x8] sm:$0xff]  ;;  %3954 = vmatmul.mubr.msk.bf16.vlgmr.msra.gmra.mrb[0].mxu1 %vm2939_vm11, %v2905_v60  ;;  %v4233_v59 = vld [vmem:[%s4463_s8 + $0xb4] sm:$0xfe]   ;;  %v1539_v50 = vrot.slane %v1537_v44, 1  ;;  %v2533_v44 = vshll.u32 %v4267_v36, 16 }
  0xda   : > { %1082 = vst.msk [vmem:[#allocation2 + $0x10] sm:$0xff] %vm1079_vm4, %v1036_v62  ;;  %3938 = vmatmul.mubr.msk.bf16.vlgmr.msra.gmra.mrb[0].mxu0 %vm2939_vm11, %v2897_v0  ;;  %769 = vrot.lane.b32.xlu1 %v728_v15, %s4367_s11  ;;  %v4234_v60 = vld [vmem:[%s4463_s8 + $0xbc] ss:$0 sps:$4 sm:$0x11]   ;;  %v1028_v62 = vrot.slane %v4233_v59, 1  ;;  %v4269_v40 = vld [vmem:[%s4463_s8 + $0x6c] sm:$0xff]  }
  0xdb   : > { %753 = vrot.lane.b32.xlu0 %v632_v27, %s4367_s11  ;;  %v4235_v0 = vld [vmem:[%s4463_s8 + $0x54] sm:$0xfe]   ;;  %v1029_v2 = vrot.slane %v4234_v60, 1  ;;  %v4242_v15 = vld [vmem:[%s4463_s8 + $0xbc] ss:$0 sps:$4 sm:$0x11]   ;;  %v1540_v57 = vor.u32 %v1539_v50, %v1535_v43 }
  0xdc   : > { %v1054_v12 = vpop.permute.xlu1 %1053  ;;  %v1004_v5 = vrot.slane %v4235_v0, 1  ;;  %v1626_v21 = vshll.u32 %v4242_v15, 16  ;;  %v1525_v27 = vshll.u32 %v4243_v11, 16  ;;  %v4251_v59 = vld [vmem:[%s4463_s8 + $0x54] sm:$0xfe]   ;;  %v4257_v11 = vld [vmem:[%s4463_s8 + $0xc0] sm:$0xff]  }
  0xdd   : > { %1091 = vst.msk [vmem:[#allocation2 + $0x58] sm:$0xff] %vm1079_vm4, %v1054_v12  ;;  %v1038_v17 = vpop.permute.xlu0 %1037  ;;  %v1030_v6 = vsel %vm982_vm0, %v1028_v62, %v1029_v2  ;;  %v4252_v60 = vld [vmem:[%s4463_s8 + $0x5c] ss:$0 sps:$4 sm:$0x11]   ;;  %v1901_v62 = vrot.slane %v4251_v59, 1  ;;  %v2531_v43 = vshrl.u32 %v4267_v36, 16 }
  0xde   : > { %1083 = vst.msk [vmem:[#allocation2 + $0x18] sm:$0xff] %vm1079_vm4, %v1038_v17  ;;  %2857 = vrot.lane.b32.xlu1 %v2824_v22, %s4372_s16  ;;  %v1006_v12 = vsel %vm982_vm0, %v1004_v5, %v1005_v7  ;;  %v1621_v17 = vshll.u32 %v4241_v9, 16  ;;  %v4245_v22 = vld [vmem:[%s4463_s8 + $0xc0] sm:$0xff]   ;;  %v1628_v29 = vrot.slane %v1626_v21, 1  ;;  %v1527_v31 = vrot.slane %v1525_v27, 1  ;;  %v4259_v27 = vld [vmem:[%s4463_s8 + $0xcc] sm:$0xff]  }
  0xdf   : > { %2841 = vrot.lane.b32.xlu0 %v2800_v33, %s4372_s16  ;;  %v1631_v32 = vshrl.u32 %v4245_v22, 16  ;;  %v1633_v33 = vshll.u32 %v4245_v22, 16  ;;  %v1902_v0 = vrot.slane %v4252_v60, 1  ;;  %v4253_v2 = vld [vmem:[%s4463_s8 + $0xc0] sm:$0xfe]   ;;  %v2535_v52 = vrot.slane %v2533_v44, 1 }
  0xe0   : > { %v1230_v26 = vpop.permute.xlu1 %1229  ;;  %v1623_v20 = vrot.slane %v1621_v17, 1  ;;  %v1528_v37 = vor.u32 %v1527_v31, %v1523_v24  ;;  %v4255_v7 = vld [vmem:[%s4463_s8 + $0x60] sm:$0xfe]   ;;  %v4256_v9 = vld [vmem:[%s4463_s8 + $0x68] ss:$0 sps:$4 sm:$0x11]  }
  0xe1   : > { %1268 = vst.msk [vmem:[#allocation2 + $0x50] sm:$0xff] %vm1257_vm5, %v1230_v26  ;;  %v1214_v30 = vpop.permute.xlu0 %1213  ;;  %v1635_v39 = vrot.slane %v1633_v33, 1  ;;  %v4258_v21 = vld [vmem:[%s4463_s8 + $0x60] sm:$0xff]   ;;  %v4266_v31 = vld [vmem:[%s4463_s8 + $0x68] ss:$0 sps:$4 sm:$0x11]  }
  0xe2   : > { %1260 = vst.msk [vmem:[#allocation2 + $0x10] sm:$0xff] %vm1257_vm5, %v1214_v30  ;;  %771 = vrot.lane.b32.xlu1 %v740_v48, %s4367_s11  ;;  %v1624_v28 = vor.u32 %v1623_v20, %v1619_v16  ;;  %v1530_v30 = vshll.u32 %v4244_v23, 16  ;;  %v4249_v48 = vld [vmem:[%s4463_s8 + $0xb4] sm:$0xfe]   ;;  %v4263_v24 = vld [vmem:[%s4463_s8 + $0xc0] sm:$0xff]   ;;  %v4260_v33 = vld [vmem:[%s4463_s8 + $0x6c] sm:$0xff]  }
  0xe3   : > { %755 = vrot.lane.b32.xlu0 %v644_v55, %s4367_s11  ;;  %v1636_v45 = vor.u32 %v1635_v39, %v1631_v32  ;;  %v1925_v55 = vrot.slane %v4249_v48, 1  ;;  %v4261_v16 = vld [vmem:[%s4463_s8 + $0x90] sm:$0xff]   ;;  %v2519_v22 = vshrl.u32 %v4263_v24, 16  ;;  %v2430_v39 = vshll.u32 %v4266_v31, 16  ;;  %v4272_v60 = vld [vmem:[%s4463_s8 + $0x3c] sm:$0xff]   ;;  %s3388_s11 = sshll.u32 %s213_s7, 8 }
  0xe4   : > { %v1232_v38 = vpop.permute.xlu1 %1231  ;;  %v1532_v34 = vrot.slane %v1530_v30, 1  ;;  %v1629_v42 = vsel %vm548_vm1, %v1624_v28, %v1628_v29  ;;  %368 = vst.msk [vmem:[#allocation2 + $0x60] sm:$0xff] %vm355_vm2, %v4261_v16  ;;  %v4262_v20 = vld [vmem:[%s4463_s8 + $0x30] sm:$0xff]   ;;  %v2521_v28 = vshll.u32 %v4263_v24, 16  ;;  %361 = vst.msk [vmem:[#allocation2 + $0x28] sm:$0xff] %vm355_vm2, %v4272_v60  ;;  %v4282_v24 = vld [vmem:[%s4463_s8 + $0x48] sm:$0xff]  }
  0xe5   : > { %1269 = vst.msk [vmem:[#allocation2 + $0x58] sm:$0xff] %vm1257_vm5, %v1232_v38  ;;  %v1216_v41 = vpop.permute.xlu0 %1215  ;;  %v1927_v5 = vsel %vm982_vm0, %v1925_v55, %v1926_v58  ;;  %v2536_v58 = vor.u32 %v2535_v52, %v2531_v43 }
  0xe6   : > { %1261 = vst.msk [vmem:[#allocation2 + $0x18] sm:$0xff] %vm1257_vm5, %v1216_v41  ;;  %1059 = vrot.lane.b32.xlu1 %v1027_v56, %s4366_s10  ;;  %v4248_v41 = vld [vmem:[%s4463_s8 + $0x68] ss:$0 sps:$4 sm:$0x11]   ;;  %v1533_v49 = vsel %vm548_vm1, %v1528_v37, %v1532_v34  ;;  %v1641_v56 = vsel %vm548_vm1, %v1636_v45, %v1640_v46  ;;  %v4271_v45 = vld [vmem:[%s4463_s8 + $0x9c] sm:$0xff]  }
  0xe7   : > { %1043 = vrot.lane.b32.xlu0 %v1003_v61, %s4366_s10  ;;  %v1542_v47 = vshll.u32 %v4248_v41, 16  ;;  %360 = vst.msk [vmem:[#allocation2 + $0x20] sm:$0xff] %vm355_vm2, %v4262_v20  ;;  %369 = vst.msk [vmem:[#allocation2 + $0x68] sm:$0xff] %vm355_vm2, %v4271_v45 }
  0xe8   : > { %v1663_v53 = vpop.permute.xlu1 %1662  ;;  %362 = vst.msk [vmem:[#allocation2 + $0x30] sm:$0xff] %vm355_vm2, %v4282_v24 }
  0xe9   : > { %1701 = vst.msk [vmem:[#allocation2 + $0x50] sm:$0xff] %vm1690_vm6, %v1663_v53  ;;  %v1647_v54 = vpop.permute.xlu0 %1646  ;;  %v1544_v53 = vrot.slane %v1542_v47, 1  ;;  %v2432_v47 = vrot.slane %v2430_v39, 1 }
  0xea   : > { %1693 = vst.msk [vmem:[#allocation2 + $0x10] sm:$0xff] %vm1690_vm6, %v1647_v54  ;;  %1061 = vrot.lane.b32.xlu1 %v1030_v6, %s4366_s10  ;;  %v1928_v6 = vrot.slane %v4253_v2, 1  ;;  %v4273_v2 = vld [vmem:[%s4463_s8 + $0xc0] sm:$0xfe]  }
  0xeb   : > { %1045 = vrot.lane.b32.xlu0 %v1006_v12, %s4366_s10  ;;  %v1545_v61 = vsel %vm548_vm1, %v1540_v57, %v1544_v53  ;;  %v1904_v12 = vrot.slane %v4255_v7, 1  ;;  %v2437_v57 = vshll.u32 %v4269_v40, 16 }
  0xec   : > { %v1665_v1 = vpop.permute.xlu1 %1664 }
  0xed   : > { %1702 = vst.msk [vmem:[#allocation2 + $0x58] sm:$0xff] %vm1690_vm6, %v1665_v1  ;;  %v1649_v4 = vpop.permute.xlu0 %1648 }
  0xee   : > { %1694 = vst.msk [vmem:[#allocation2 + $0x18] sm:$0xff] %vm1690_vm6, %v1649_v4  ;;  %1237 = vrot.lane.b32.xlu1 %v4237_v8, %s4365_s9  ;;  %v4254_v4 = vld [vmem:[%s4463_s8 + $0xc8] ss:$0 sps:$4 sm:$0x11]  }
  0xef   : > { %1221 = vrot.lane.b32.xlu0 %v4238_v13, %s4365_s9  ;;  %v1929_v8 = vrot.slane %v4254_v4, 1 }
  0xf0   : > { %v1952_v10 = vpop.permute.xlu1 %1951 }
  0xf1   : > { %1990 = vst.msk [vmem:[#allocation2 + $0x50] sm:$0xff] %vm1979_vm7, %v1952_v10  ;;  %v1936_v14 = vpop.permute.xlu0 %1935  ;;  %v1903_v10 = vsel %vm982_vm0, %v1901_v62, %v1902_v0  ;;  %v1930_v17 = vsel %vm982_vm0, %v1928_v6, %v1929_v8  ;;  %v2439_v62 = vrot.slane %v2437_v57, 1  ;;  %v4274_v6 = vld [vmem:[%s4463_s8 + $0xc8] ss:$0 sps:$4 sm:$0x11]   ;;  %v2825_v8 = vrot.slane %v4273_v2, 1 }
  0xf2   : > { %1982 = vst.msk [vmem:[#allocation2 + $0x10] sm:$0xff] %vm1979_vm7, %v1936_v14  ;;  %1239 = vrot.lane.b32.xlu1 %v4239_v18, %s4365_s9  ;;  %v1905_v14 = vrot.slane %v4256_v9, 1  ;;  %v4281_v9 = vld [vmem:[%s4463_s8 + $0xa8] sm:$0xff]  }
  0xf3   : > { %1223 = vrot.lane.b32.xlu0 %v4240_v25, %s4365_s9  ;;  %v4264_v25 = vld [vmem:[%s4463_s8 + $0xc8] ss:$0 sps:$4 sm:$0x11]   ;;  %370 = vst.msk [vmem:[#allocation2 + $0x70] sm:$0xff] %vm355_vm2, %v4281_v9 }
  0xf4   : > { %v1954_v19 = vpop.permute.xlu1 %1953  ;;  %v1906_v18 = vsel %vm982_vm0, %v1904_v12, %v1905_v14  ;;  %v2526_v30 = vshll.u32 %v4264_v25, 16  ;;  %v2826_v12 = vrot.slane %v4274_v6, 1  ;;  %v4276_v14 = vld [vmem:[%s4463_s8 + $0x68] ss:$0 sps:$4 sm:$0x11]  }
  0xf5   : > { %1991 = vst.msk [vmem:[#allocation2 + $0x58] sm:$0xff] %vm1979_vm7, %v1954_v19  ;;  %v1938_v26 = vpop.permute.xlu0 %1937 }
  0xf6   : > { %1983 = vst.msk [vmem:[#allocation2 + $0x18] sm:$0xff] %vm1979_vm7, %v1938_v26  ;;  %1670 = vrot.lane.b32.xlu1 %v1629_v42, %s4368_s12  ;;  %v4265_v26 = vld [vmem:[%s4463_s8 + $0x60] sm:$0xff]   ;;  %v2528_v37 = vrot.slane %v2526_v30, 1  ;;  %v4268_v42 = vld [vmem:[%s4463_s8 + $0xd4] ss:$0 sps:$4 sm:$0x11]  }
  0xf7   : > { %1654 = vrot.lane.b32.xlu0 %v1533_v49, %s4368_s12  ;;  %v2423_v63 = vshrl.u32 %v4265_v26, 16  ;;  %v2425_v32 = vshll.u32 %v4265_v26, 16  ;;  %v2538_v53 = vshll.u32 %v4268_v42, 16  ;;  %v4283_v30 = vld [vmem:[%s4463_s8 + $0xb4] sm:$0xff]  }
  0xf8   : > { %v2130_v35 = vpop.permute.xlu1 %2129  ;;  %371 = vst.msk [vmem:[#allocation2 + $0x78] sm:$0xff] %vm355_vm2, %v4283_v30 }
  0xf9   : > { %2168 = vst.msk [vmem:[#allocation2 + $0x50] sm:$0xff] %vm2157_vm8, %v2130_v35  ;;  %v2114_v38 = vpop.permute.xlu0 %2113  ;;  %v2523_v35 = vrot.slane %v2521_v28, 1  ;;  %v2540_v59 = vrot.slane %v2538_v53, 1 }
  0xfa   : > { %2160 = vst.msk [vmem:[#allocation2 + $0x10] sm:$0xff] %vm2157_vm8, %v2114_v38  ;;  %1672 = vrot.lane.b32.xlu1 %v1641_v56, %s4368_s12  ;;  %v2427_v38 = vrot.slane %v2425_v32, 1  ;;  %v4270_v56 = vld [vmem:[%s4463_s8 + $0x74] ss:$0 sps:$4 sm:$0x11]  }
  0xfb   : > { %1656 = vrot.lane.b32.xlu0 %v1545_v61, %s4368_s12  ;;  %v2524_v41 = vor.u32 %v2523_v35, %v2519_v22  ;;  %v2442_v0 = vshll.u32 %v4270_v56, 16  ;;  %v4279_v22 = vld [vmem:[%s4463_s8 + $0x6c] sm:$0xfe]   ;;  %s5130_s12 = scalar_lea.vmem [#allocation4], %s3388_s11 }
  0xfc   : > { %v2132_v51 = vpop.permute.xlu1 %2131  ;;  %v2428_v46 = vor.u32 %v2427_v38, %v2423_v63  ;;  %v2804_v63 = vrot.slane %v4279_v22, 1 }
  0xfd   : > { %2169 = vst.msk [vmem:[#allocation2 + $0x58] sm:$0xff] %vm2157_vm8, %v2132_v51  ;;  %v2116_v54 = vpop.permute.xlu0 %2115  ;;  %v2529_v55 = vsel %vm548_vm1, %v2524_v41, %v2528_v37 }
  0xfe   : > { %2161 = vst.msk [vmem:[#allocation2 + $0x18] sm:$0xff] %vm2157_vm8, %v2116_v54  ;;  %1959 = vrot.lane.b32.xlu1 %v1927_v5, %s4369_s13  ;;  %v2435_v54 = vshrl.u32 %v4269_v40, 16  ;;  %v2433_v61 = vsel %vm548_vm1, %v2428_v46, %v2432_v47  ;;  %v2444_v5 = vrot.slane %v2442_v0, 1 }
  0xff   : > { %1943 = vrot.lane.b32.xlu0 %v1903_v10, %s4369_s13 }
 0x100   : > { %v2563_v1 = vpop.permute.xlu1 %2562  ;;  %v2440_v4 = vor.u32 %v2439_v62, %v2435_v54 }
 0x101   : > { %2601 = vst.msk [vmem:[#allocation2 + $0x50] sm:$0xff] %vm2590_vm9, %v2563_v1  ;;  %v2547_v3 = vpop.permute.xlu0 %2546 }
 0x102   : > { %2593 = vst.msk [vmem:[#allocation2 + $0x10] sm:$0xff] %vm2590_vm9, %v2547_v3  ;;  %1961 = vrot.lane.b32.xlu1 %v1930_v17, %s4369_s13  ;;  %v2541_v3 = vsel %vm548_vm1, %v2536_v58, %v2540_v59  ;;  %v2445_v10 = vsel %vm548_vm1, %v2440_v4, %v2444_v5 }
 0x103   : > { %1945 = vrot.lane.b32.xlu0 %v1906_v18, %s4369_s13  ;;  %s3911_s13 = sshll.u32 %s4355_s20, 12 }
 0x104   : > { %v2565_v13 = vpop.permute.xlu1 %2564 }
 0x105   : > { %2602 = vst.msk [vmem:[#allocation2 + $0x58] sm:$0xff] %vm2590_vm9, %v2565_v13  ;;  %v2549_v15 = vpop.permute.xlu0 %2548  ;;  %v4275_v13 = vld [vmem:[%s4463_s8 + $0x60] sm:$0xfe]  }
 0x106   : > { %2594 = vst.msk [vmem:[#allocation2 + $0x18] sm:$0xff] %vm2590_vm9, %v2549_v15  ;;  %2137 = vrot.lane.b32.xlu1 %v4257_v11, %s4370_s14  ;;  %v2827_v11 = vsel %vm982_vm0, %v2825_v8, %v2826_v12  ;;  %v2801_v18 = vrot.slane %v4275_v13, 1 }
 0x107   : > { %2121 = vrot.lane.b32.xlu0 %v4258_v21, %s4370_s14  ;;  %v4277_v21 = vld [vmem:[%s4463_s8 + $0xcc] sm:$0xfe]  }
 0x108   : > { %v2852_v19 = vpop.permute.xlu1 %2851  ;;  %v2828_v26 = vrot.slane %v4277_v21, 1 }
 0x109   : > { %2890 = vst.msk [vmem:[#allocation2 + $0x50] sm:$0xff] %vm2879_vm10, %v2852_v19  ;;  %v2836_v23 = vpop.permute.xlu0 %2835  ;;  %v2802_v19 = vrot.slane %v4276_v14, 1 }
 0x10a   : > { %2882 = vst.msk [vmem:[#allocation2 + $0x10] sm:$0xff] %vm2879_vm10, %v2836_v23  ;;  %2139 = vrot.lane.b32.xlu1 %v4259_v27, %s4370_s14  ;;  %v4278_v23 = vld [vmem:[%s4463_s8 + $0xd4] ss:$0 sps:$4 sm:$0x11]  }
 0x10b   : > { %2123 = vrot.lane.b32.xlu0 %v4260_v33, %s4370_s14  ;;  %v2803_v25 = vsel %vm982_vm0, %v2801_v18, %v2802_v19  ;;  %v2829_v27 = vrot.slane %v4278_v23, 1  ;;  %v4284_v33 = vld [vmem:[%s4463_s8 + $0x54] sm:$0xff]   ;;  %s3301_s14 = sshll.u32 %s5130_s12, 4  ;;  %s5255_s14 = int_to_ptr.vmem [resolvable:$true] %s3301_s14 }
 0x10c   : > { %v766_v29 = vpop.permute.xlu1 %765  ;;  %363 = vst.msk [vmem:[#allocation2 + $0x38] sm:$0xff] %vm355_vm2, %v4284_v33  ;;  %s4285_s23 = scalar_lea.vmem %s5255_s14, 4096  ;;  %p4292_p1 = scmp.lt.s32.totalorder %s5255_s14, %s4290_s27 }
 0x10d   : > { %802 = vst.msk [vmem:[#allocation2 + $0x60] sm:$0xff] %vm789_vm3, %v766_v29  ;;  %v750_v34 = vpop.permute.xlu0 %749  ;;  %v4280_v29 = vld [vmem:[%s4463_s8 + $0x74] ss:$0 sps:$4 sm:$0x11]   ;;  %v2830_v31 = vsel %vm982_vm0, %v2828_v26, %v2829_v27  ;;  %p4286_p12 = scmp.ne.s32.totalorder %s5255_s14, %s4285_s23  ;;  %p4293_p2 = scmp.lt.s32.totalorder %s4291_s30, %s4285_s23 }
 0x10e   : > { %794 = vst.msk [vmem:[#allocation2 + $0x20] sm:$0xff] %vm789_vm3, %v750_v34  ;;  %2570 = vrot.lane.b32.xlu1 %v2529_v55, %s4371_s15  ;;  %v2805_v34 = vrot.slane %v4280_v29, 1 }
 0x10f   : > { %2554 = vrot.lane.b32.xlu0 %v2433_v61, %s4371_s15  ;;  %p4287_p13 = pnand %p4286_p12, %p4443_p4  ;;  %p4294_p3 = por %p4293_p2, %p4292_p1 }
 0x110   : > { %v2854_v48 = vpop.permute.xlu1 %2853  ;;  %v2906_v49 = vld [vmem:[#allocation2 + $0x50] sm:$0xff]  ;;  %v2806_v36 = vsel %vm982_vm0, %v2804_v63, %v2805_v34 }
 0x111   : > { %2891 = vst.msk [vmem:[#allocation2 + $0x58] sm:$0xff] %vm2879_vm10, %v2854_v48  ;;  %v2838_v50 = vpop.permute.xlu0 %2837  ;;  %v2898_v51 = vld [vmem:[#allocation2 + $0x10] sm:$0xff]  ;;  %3957 = vmatprep.mubr.msk.bf16.mxu1 %vm2939_vm11, %v2906_v49  ;;  %p4288_p0 = pneg %p4287_p13 }
 0x112   : > { %2883 = vst.msk [vmem:[#allocation2 + $0x18] sm:$0xff] %vm2879_vm10, %v2838_v50  ;;  %3941 = vmatprep.mubr.msk.bf16.mxu0 %vm2939_vm11, %v2898_v51  ;;  %2572 = vrot.lane.b32.xlu1 %v2541_v3, %s4371_s15 }
 0x113   : > { %2556 = vrot.lane.b32.xlu0 %v2445_v10, %s4371_s15  ;;  %p4295_p5 = pnand %p4294_p3, %p4288_p0 }
 0x114   : > { %v768_v1 = vpop.permute.xlu1 %767 }
 0x115   : > { %803 = vst.msk [vmem:[#allocation2 + $0x68] sm:$0xff] %vm789_vm3, %v768_v1  ;;  %v752_v7 = vpop.permute.xlu0 %751 }
 0x116   : > { %795 = vst.msk [vmem:[#allocation2 + $0x28] sm:$0xff] %vm789_vm3, %v752_v7  ;;  %2859 = vrot.lane.b32.xlu1 %v2827_v11, %s4372_s16 }
 0x117   : > { %2843 = vrot.lane.b32.xlu0 %v2803_v25, %s4372_s16 }
 0x118   : > { %v1056_v15 = vpop.permute.xlu1 %1055  ;;  %v2907_v17 = vld [vmem:[#allocation2 + $0x58] sm:$0xff] }
 0x119   : > { %v2899_v16 = vld [vmem:[#allocation2 + $0x18] sm:$0xff]  ;;  %1092 = vst.msk [vmem:[#allocation2 + $0x60] sm:$0xff] %vm1079_vm4, %v1056_v15  ;;  %3958 = vmatmul.mubr.msk.bf16.gmra.mrb[4].mxu1 %vm2939_vm11, %v2907_v17  ;;  %v1040_v20 = vpop.permute.xlu0 %1039 }
 0x11a   : > { %3942 = vmatmul.mubr.msk.bf16.gmra.mrb[4].mxu0 %vm2939_vm11, %v2899_v16  ;;  %1084 = vst.msk [vmem:[#allocation2 + $0x20] sm:$0xff] %vm1079_vm4, %v1040_v20  ;;  %2861 = vrot.lane.b32.xlu1 %v2830_v31, %s4372_s16 }
 0x11b   : > { %2845 = vrot.lane.b32.xlu0 %v2806_v36, %s4372_s16  ;;  %v5114_v36 = vld [vmem:[%s5310_s2] ss:$0 sm:$0xff]  ;;  %s5251_s16 = scalar_lea.hbm %s5312_s4, %s3911_s13 }
 0x11c   : > { %v1058_v28 = vpop.permute.xlu1 %1057 }
 0x11d   : > { %1093 = vst.msk [vmem:[#allocation2 + $0x68] sm:$0xff] %vm1079_vm4, %v1058_v28  ;;  %v1042_v32 = vpop.permute.xlu0 %1041 }
 0x11e   : > { %1085 = vst.msk [vmem:[#allocation2 + $0x28] sm:$0xff] %vm1079_vm4, %v1042_v32 }
 0x120   : > { %v1234_v35 = vpop.permute.xlu1 %1233 }
 0x121   : > { %1270 = vst.msk [vmem:[#allocation2 + $0x60] sm:$0xff] %vm1257_vm5, %v1234_v35  ;;  %v1218_v37 = vpop.permute.xlu0 %1217 }
 0x122   : > { %1262 = vst.msk [vmem:[#allocation2 + $0x20] sm:$0xff] %vm1257_vm5, %v1218_v37  ;;  %v5118_v37 = vstv %s3153_s6 }
 0x124   : > { %v1236_v38 = vpop.permute.xlu1 %1235 }
 0x125   : > { %1271 = vst.msk [vmem:[#allocation2 + $0x68] sm:$0xff] %vm1257_vm5, %v1236_v38  ;;  %v1220_v39 = vpop.permute.xlu0 %1219 }
 0x126   : > { %1263 = vst.msk [vmem:[#allocation2 + $0x28] sm:$0xff] %vm1257_vm5, %v1220_v39 }
 0x128   : > { %v1667_v40 = vpop.permute.xlu1 %1666 }
 0x129   : > { %1703 = vst.msk [vmem:[#allocation2 + $0x60] sm:$0xff] %vm1690_vm6, %v1667_v40  ;;  %v1651_v41 = vpop.permute.xlu0 %1650 }
 0x12a   : > { %1695 = vst.msk [vmem:[#allocation2 + $0x20] sm:$0xff] %vm1690_vm6, %v1651_v41 }
 0x12c   : > { %v1669_v42 = vpop.permute.xlu1 %1668 }
 0x12d   : > { %1704 = vst.msk [vmem:[#allocation2 + $0x68] sm:$0xff] %vm1690_vm6, %v1669_v42  ;;  %v1653_v43 = vpop.permute.xlu0 %1652 }
 0x12e   : > { %1696 = vst.msk [vmem:[#allocation2 + $0x28] sm:$0xff] %vm1690_vm6, %v1653_v43 }
 0x130   : > { %v1956_v44 = vpop.permute.xlu1 %1955 }
 0x131   : > { %1992 = vst.msk [vmem:[#allocation2 + $0x60] sm:$0xff] %vm1979_vm7, %v1956_v44  ;;  %v1940_v45 = vpop.permute.xlu0 %1939 }
 0x132   : > { %1984 = vst.msk [vmem:[#allocation2 + $0x20] sm:$0xff] %vm1979_vm7, %v1940_v45 }
 0x134   : > { %v1958_v46 = vpop.permute.xlu1 %1957 }
 0x135   : > { %1993 = vst.msk [vmem:[#allocation2 + $0x68] sm:$0xff] %vm1979_vm7, %v1958_v46  ;;  %v1942_v47 = vpop.permute.xlu0 %1941 }
 0x136   : > { %1985 = vst.msk [vmem:[#allocation2 + $0x28] sm:$0xff] %vm1979_vm7, %v1942_v47 }
 0x138   : > { %v2134_v48 = vpop.permute.xlu1 %2133 }
 0x139   : > { %2170 = vst.msk [vmem:[#allocation2 + $0x60] sm:$0xff] %vm2157_vm8, %v2134_v48  ;;  %v2118_v49 = vpop.permute.xlu0 %2117 }
 0x13a   : > { %2162 = vst.msk [vmem:[#allocation2 + $0x20] sm:$0xff] %vm2157_vm8, %v2118_v49 }
 0x13c   : > { %v2136_v50 = vpop.permute.xlu1 %2135 }
 0x13d   : > { %2171 = vst.msk [vmem:[#allocation2 + $0x68] sm:$0xff] %vm2157_vm8, %v2136_v50  ;;  %v2120_v51 = vpop.permute.xlu0 %2119 }
 0x13e   : > { %2163 = vst.msk [vmem:[#allocation2 + $0x28] sm:$0xff] %vm2157_vm8, %v2120_v51 }
 0x140   : > { %v2567_v52 = vpop.permute.xlu1 %2566 }
 0x141   : > { %2603 = vst.msk [vmem:[#allocation2 + $0x60] sm:$0xff] %vm2590_vm9, %v2567_v52  ;;  %v2551_v53 = vpop.permute.xlu0 %2550 }
 0x142   : > { %2595 = vst.msk [vmem:[#allocation2 + $0x20] sm:$0xff] %vm2590_vm9, %v2551_v53 }
 0x144   : > { %v2569_v54 = vpop.permute.xlu1 %2568 }
 0x145   : > { %2604 = vst.msk [vmem:[#allocation2 + $0x68] sm:$0xff] %vm2590_vm9, %v2569_v54  ;;  %v2553_v55 = vpop.permute.xlu0 %2552 }
 0x146   : > { %2596 = vst.msk [vmem:[#allocation2 + $0x28] sm:$0xff] %vm2590_vm9, %v2553_v55 }
 0x148   : > { %v2856_v56 = vpop.permute.xlu1 %2855 }
 0x149   : > { %2892 = vst.msk [vmem:[#allocation2 + $0x60] sm:$0xff] %vm2879_vm10, %v2856_v56  ;;  %v2840_v57 = vpop.permute.xlu0 %2839 }
 0x14a   : > { %2884 = vst.msk [vmem:[#allocation2 + $0x20] sm:$0xff] %vm2879_vm10, %v2840_v57 }
 0x14c   : > { %v770_v58 = vpop.permute.xlu1 %769 }
 0x14d   : > { %804 = vst.msk [vmem:[#allocation2 + $0x70] sm:$0xff] %vm789_vm3, %v770_v58  ;;  %v754_v60 = vpop.permute.xlu0 %753 }
 0x14e   : > { %796 = vst.msk [vmem:[#allocation2 + $0x30] sm:$0xff] %vm789_vm3, %v754_v60 }
 0x150   : > { %v2908_v59 = vld [vmem:[#allocation2 + $0x60] sm:$0xff]  ;;  %v2858_v61 = vpop.permute.xlu1 %2857 }
 0x151   : > { %3961 = vmatprep.mubr.msk.bf16.mxu1 %vm2939_vm11, %v2908_v59  ;;  %v2900_v62 = vld [vmem:[#allocation2 + $0x20] sm:$0xff]  ;;  %2893 = vst.msk [vmem:[#allocation2 + $0x68] sm:$0xff] %vm2879_vm10, %v2858_v61  ;;  %v2842_v0 = vpop.permute.xlu0 %2841 }
 0x152   : > { %3945 = vmatprep.mubr.msk.bf16.mxu0 %vm2939_vm11, %v2900_v62  ;;  %2885 = vst.msk [vmem:[#allocation2 + $0x28] sm:$0xff] %vm2879_vm10, %v2842_v0 }
 0x154   : > { %v772_v1 = vpop.permute.xlu1 %771 }
 0x155   : > { %805 = vst.msk [vmem:[#allocation2 + $0x78] sm:$0xff] %vm789_vm3, %v772_v1  ;;  %v756_v3 = vpop.permute.xlu0 %755 }
 0x156   : > { %797 = vst.msk [vmem:[#allocation2 + $0x38] sm:$0xff] %vm789_vm3, %v756_v3 }
 0x158   : > { %v2909_v2 = vld [vmem:[#allocation2 + $0x68] sm:$0xff]  ;;  %v1060_v4 = vpop.permute.xlu1 %1059 }
 0x159   : > { %3962 = vmatmul.mubr.msk.bf16.gmra.mrb[8].mxu1 %vm2939_vm11, %v2909_v2  ;;  %1094 = vst.msk [vmem:[#allocation2 + $0x70] sm:$0xff] %vm1079_vm4, %v1060_v4  ;;  %v2901_v5 = vld [vmem:[#allocation2 + $0x28] sm:$0xff]  ;;  %v1044_v6 = vpop.permute.xlu0 %1043 }
 0x15a   : > { %3946 = vmatmul.mubr.msk.bf16.gmra.mrb[8].mxu0 %vm2939_vm11, %v2901_v5  ;;  %1086 = vst.msk [vmem:[#allocation2 + $0x30] sm:$0xff] %vm1079_vm4, %v1044_v6 }
 0x15c   : > { %v1062_v7 = vpop.permute.xlu1 %1061 }
 0x15d   : > { %1095 = vst.msk [vmem:[#allocation2 + $0x78] sm:$0xff] %vm1079_vm4, %v1062_v7  ;;  %v1046_v8 = vpop.permute.xlu0 %1045 }
 0x15e   : > { %1087 = vst.msk [vmem:[#allocation2 + $0x38] sm:$0xff] %vm1079_vm4, %v1046_v8 }
 0x160   : > { %v1238_v9 = vpop.permute.xlu1 %1237 }
 0x161   : > { %1272 = vst.msk [vmem:[#allocation2 + $0x70] sm:$0xff] %vm1257_vm5, %v1238_v9  ;;  %v1222_v10 = vpop.permute.xlu0 %1221 }
 0x162   : > { %1264 = vst.msk [vmem:[#allocation2 + $0x30] sm:$0xff] %vm1257_vm5, %v1222_v10 }
 0x164   : > { %v1240_v12 = vpop.permute.xlu1 %1239 }
 0x165   : > { %1273 = vst.msk [vmem:[#allocation2 + $0x78] sm:$0xff] %vm1257_vm5, %v1240_v12  ;;  %v1224_v13 = vpop.permute.xlu0 %1223 }
 0x166   : > { %1265 = vst.msk [vmem:[#allocation2 + $0x38] sm:$0xff] %vm1257_vm5, %v1224_v13 }
 0x168   : > { %v1671_v14 = vpop.permute.xlu1 %1670 }
 0x169   : > { %1705 = vst.msk [vmem:[#allocation2 + $0x70] sm:$0xff] %vm1690_vm6, %v1671_v14  ;;  %v1655_v15 = vpop.permute.xlu0 %1654 }
 0x16a   : > { %1697 = vst.msk [vmem:[#allocation2 + $0x30] sm:$0xff] %vm1690_vm6, %v1655_v15 }
 0x16c   : > { %v1673_v16 = vpop.permute.xlu1 %1672 }
 0x16d   : > { %1706 = vst.msk [vmem:[#allocation2 + $0x78] sm:$0xff] %vm1690_vm6, %v1673_v16  ;;  %v1657_v17 = vpop.permute.xlu0 %1656 }
 0x16e   : > { %1698 = vst.msk [vmem:[#allocation2 + $0x38] sm:$0xff] %vm1690_vm6, %v1657_v17 }
 0x170   : > { %v1960_v11 = vpop.permute.xlu1 %1959 }
 0x171   : > { %1994 = vst.msk [vmem:[#allocation2 + $0x70] sm:$0xff] %vm1979_vm7, %v1960_v11  ;;  %v1944_v18 = vpop.permute.xlu0 %1943 }
 0x172   : > { %1986 = vst.msk [vmem:[#allocation2 + $0x30] sm:$0xff] %vm1979_vm7, %v1944_v18 }
 0x174   : > { %v1962_v19 = vpop.permute.xlu1 %1961 }
 0x175   : > { %1995 = vst.msk [vmem:[#allocation2 + $0x78] sm:$0xff] %vm1979_vm7, %v1962_v19  ;;  %v1946_v20 = vpop.permute.xlu0 %1945 }
 0x176   : > { %1987 = vst.msk [vmem:[#allocation2 + $0x38] sm:$0xff] %vm1979_vm7, %v1946_v20 }
 0x178   : > { %v2138_v21 = vpop.permute.xlu1 %2137 }
 0x179   : > { %2172 = vst.msk [vmem:[#allocation2 + $0x70] sm:$0xff] %vm2157_vm8, %v2138_v21  ;;  %v2122_v23 = vpop.permute.xlu0 %2121 }
 0x17a   : > { %2164 = vst.msk [vmem:[#allocation2 + $0x30] sm:$0xff] %vm2157_vm8, %v2122_v23 }
 0x17c   : > { %v2140_v24 = vpop.permute.xlu1 %2139 }
 0x17d   : > { %2173 = vst.msk [vmem:[#allocation2 + $0x78] sm:$0xff] %vm2157_vm8, %v2140_v24  ;;  %v2124_v25 = vpop.permute.xlu0 %2123 }
 0x17e   : > { %2165 = vst.msk [vmem:[#allocation2 + $0x38] sm:$0xff] %vm2157_vm8, %v2124_v25 }
 0x180   : > { %v2571_v26 = vpop.permute.xlu1 %2570 }
 0x181   : > { %2605 = vst.msk [vmem:[#allocation2 + $0x70] sm:$0xff] %vm2590_vm9, %v2571_v26  ;;  %v2555_v27 = vpop.permute.xlu0 %2554 }
 0x182   : > { %2597 = vst.msk [vmem:[#allocation2 + $0x30] sm:$0xff] %vm2590_vm9, %v2555_v27 }
 0x184   : > { %v2573_v22 = vpop.permute.xlu1 %2572 }
 0x185   : > { %2606 = vst.msk [vmem:[#allocation2 + $0x78] sm:$0xff] %vm2590_vm9, %v2573_v22  ;;  %v2557_v28 = vpop.permute.xlu0 %2556 }
 0x186   : > { %2598 = vst.msk [vmem:[#allocation2 + $0x38] sm:$0xff] %vm2590_vm9, %v2557_v28 }
 0x188   : > { %v2860_v29 = vpop.permute.xlu1 %2859 }
 0x189   : > { %2894 = vst.msk [vmem:[#allocation2 + $0x70] sm:$0xff] %vm2879_vm10, %v2860_v29  ;;  %v2844_v30 = vpop.permute.xlu0 %2843 }
 0x18a   : > { %2886 = vst.msk [vmem:[#allocation2 + $0x30] sm:$0xff] %vm2879_vm10, %v2844_v30 }
 0x18c   : > { %v2862_v31 = vpop.permute.xlu1 %2861 }
 0x18d   : > { %2895 = vst.msk [vmem:[#allocation2 + $0x78] sm:$0xff] %vm2879_vm10, %v2862_v31  ;;  %v2846_v63 = vpop.permute.xlu0 %2845 }
 0x18e   : > { %2887 = vst.msk [vmem:[#allocation2 + $0x38] sm:$0xff] %vm2879_vm10, %v2846_v63 }
 0x190   : > { %v2910_v32 = vld [vmem:[#allocation2 + $0x70] sm:$0xff] }
 0x191   : > { %3965 = vmatprep.mubr.msk.bf16.mxu1 %vm2939_vm11, %v2910_v32  ;;  %v2902_v33 = vld [vmem:[#allocation2 + $0x30] sm:$0xff] }
 0x192   : > { %3949 = vmatprep.mubr.msk.bf16.mxu0 %vm2939_vm11, %v2902_v33 }
 0x194   : > { %v2911_v34 = vld [vmem:[#allocation2 + $0x78] sm:$0xff] }
 0x195   : > { %3966 = vmatmul.mubr.msk.bf16.gmra.mrb[12].mxu1 %vm2939_vm11, %v2911_v34  ;;  %v2903_v35 = vld [vmem:[#allocation2 + $0x38] sm:$0xff] }
 0x196   : > { %3950 = vmatmul.mubr.msk.bf16.gmra.mrb[12].mxu0 %vm2939_vm11, %v2903_v35 }
 0x1ac   : > { %v3955_v38 = vpop.f32.mrb[0].mxu1 }
 0x1ad   : > { %v3939_v39 = vpop.f32.mrb[0].mxu0  ;;  %v3099_v40 = vadd.f32 %v3955_v38, %v5114_v36  ;;  %v3090_v41 = vpop.f32.mrb[1].mxu1 }
 0x1ae   : > { %v3035_v42 = vadd.f32 %v3939_v39, %v5114_v36  ;;  %v3026_v43 = vpop.f32.mrb[1].mxu0  ;;  %v3091_v44 = vadd.f32 %v5114_v36, %v3090_v41  ;;  %v3956_v45 = vpop.f32.mrb[2].mxu1 }
 0x1af   : > { %vm3172_vm14 = vcmp.ge.f32.partialorder %v3099_v40, 0.0  ;;  %v3205_v46 = vmul.f32 %v5118_v37, %v3099_v40  ;;  %v3027_v47 = vadd.f32 %v5114_v36, %v3026_v43  ;;  %v3940_v48 = vpop.f32.mrb[2].mxu0  ;;  %v3102_v49 = vadd.f32 %v3956_v45, %v5114_v36  ;;  %v3093_v50 = vpop.f32.mrb[3].mxu1 }
 0x1b0   : > { %vm3156_vm15 = vcmp.ge.f32.partialorder %v3035_v42, 0.0  ;;  %v3189_v51 = vmul.f32 %v5118_v37, %v3035_v42  ;;  %vm3170_vm0 = vcmp.ge.f32.partialorder %v3091_v44, 0.0  ;;  %v3203_v52 = vmul.f32 %v5118_v37, %v3091_v44  ;;  %v3029_v53 = vpop.f32.mrb[3].mxu0 }
 0x1b1   : > { %v3237_v54 = vsel %vm3172_vm14, %v3099_v40, %v3205_v46  ;;  %vm3154_vm1 = vcmp.ge.f32.partialorder %v3027_v47, 0.0  ;;  %v3187_v55 = vmul.f32 %v5118_v37, %v3027_v47  ;;  %v3038_v56 = vadd.f32 %v3940_v48, %v5114_v36 }
 0x1b2   : > { %v3221_v57 = vsel %vm3156_vm15, %v3035_v42, %v3189_v51  ;;  %3270 = vst.msk [vmem:[%s5130_s12 + $0x90] sm:$0xff] %vm3251_vm13, %v3237_v54  ;;  %v3235_v58 = vsel %vm3170_vm0, %v3091_v44, %v3203_v52  ;;  %vm3173_vm2 = vcmp.ge.f32.partialorder %v3102_v49, 0.0  ;;  %v3206_v59 = vmul.f32 %v5118_v37, %v3102_v49 }
 0x1b3   : > { %3254 = vst.msk [vmem:[%s5130_s12 + $0x10] sm:$0xff] %vm3251_vm13, %v3221_v57  ;;  %v3219_v60 = vsel %vm3154_vm1, %v3027_v47, %v3187_v55  ;;  %3268 = vst.msk [vmem:[%s5130_s12 + $0x80] sm:$0xff] %vm3251_vm13, %v3235_v58  ;;  %vm3157_vm3 = vcmp.ge.f32.partialorder %v3038_v56, 0.0  ;;  %v3190_v61 = vmul.f32 %v5118_v37, %v3038_v56  ;;  %v3030_v62 = vadd.f32 %v5114_v36, %v3029_v53 }
 0x1b4   : > { %3252 = vst.msk [vmem:[%s5130_s12] sm:$0xff] %vm3251_vm13, %v3219_v60  ;;  %v3238_v0 = vsel %vm3173_vm2, %v3102_v49, %v3206_v59  ;;  %v3094_v1 = vadd.f32 %v5114_v36, %v3093_v50 }
 0x1b5   : > { %v3222_v2 = vsel %vm3157_vm3, %v3038_v56, %v3190_v61  ;;  %3271 = vst.msk [vmem:[%s5130_s12 + $0x98] sm:$0xff] %vm3251_vm13, %v3238_v0  ;;  %vm3155_vm4 = vcmp.ge.f32.partialorder %v3030_v62, 0.0  ;;  %v3188_v3 = vmul.f32 %v5118_v37, %v3030_v62 }
 0x1b6   : > { %3255 = vst.msk [vmem:[%s5130_s12 + $0x18] sm:$0xff] %vm3251_vm13, %v3222_v2  ;;  %vm3171_vm5 = vcmp.ge.f32.partialorder %v3094_v1, 0.0  ;;  %v3204_v4 = vmul.f32 %v5118_v37, %v3094_v1 }
 0x1b7   : > { %v3220_v5 = vsel %vm3155_vm4, %v3030_v62, %v3188_v3 }
 0x1b8   : > { %3253 = vst.msk [vmem:[%s5130_s12 + $0x8] sm:$0xff] %vm3251_vm13, %v3220_v5  ;;  %v3236_v6 = vsel %vm3171_vm5, %v3094_v1, %v3204_v4 }
 0x1b9   : > { %3269 = vst.msk [vmem:[%s5130_s12 + $0x88] sm:$0xff] %vm3251_vm13, %v3236_v6 }
 0x1ec   : > { %v3959_v8 = vpop.f32.mrb[4].mxu1 }
 0x1ed   : > { %v3943_v7 = vpop.f32.mrb[4].mxu0  ;;  %v3115_v10 = vadd.f32 %v3959_v8, %v5114_v36  ;;  %v3106_v13 = vpop.f32.mrb[5].mxu1 }
 0x1ee   : > { %v3051_v9 = vadd.f32 %v3943_v7, %v5114_v36  ;;  %v3042_v12 = vpop.f32.mrb[5].mxu0  ;;  %v3107_v15 = vadd.f32 %v5114_v36, %v3106_v13  ;;  %v3960_v17 = vpop.f32.mrb[6].mxu1 }
 0x1ef   : > { %v3043_v14 = vadd.f32 %v5114_v36, %v3042_v12  ;;  %v3944_v16 = vpop.f32.mrb[6].mxu0  ;;  %vm3176_vm7 = vcmp.ge.f32.partialorder %v3115_v10, 0.0  ;;  %v3209_v18 = vmul.f32 %v5118_v37, %v3115_v10  ;;  %v3109_v20 = vpop.f32.mrb[7].mxu1  ;;  %v3118_v27 = vadd.f32 %v3960_v17, %v5114_v36 }
 0x1f0   : > { %vm3160_vm6 = vcmp.ge.f32.partialorder %v3051_v9, 0.0  ;;  %v3193_v11 = vmul.f32 %v5118_v37, %v3051_v9  ;;  %v3045_v19 = vpop.f32.mrb[7].mxu0  ;;  %vm3174_vm9 = vcmp.ge.f32.partialorder %v3107_v15, 0.0  ;;  %v3207_v23 = vmul.f32 %v5118_v37, %v3107_v15 }
 0x1f1   : > { %vm3158_vm8 = vcmp.ge.f32.partialorder %v3043_v14, 0.0  ;;  %v3191_v21 = vmul.f32 %v5118_v37, %v3043_v14  ;;  %v3241_v25 = vsel %vm3176_vm7, %v3115_v10, %v3209_v18  ;;  %v3054_v26 = vadd.f32 %v3944_v16, %v5114_v36 }
 0x1f2   : > { %v3225_v24 = vsel %vm3160_vm6, %v3051_v9, %v3193_v11  ;;  %3274 = vst.msk [vmem:[%s5130_s12 + $0xb0] sm:$0xff] %vm3251_vm13, %v3241_v25  ;;  %v3239_v28 = vsel %vm3174_vm9, %v3107_v15, %v3207_v23  ;;  %v3046_v29 = vadd.f32 %v5114_v36, %v3045_v19  ;;  %v3110_v30 = vadd.f32 %v5114_v36, %v3109_v20 }
 0x1f3   : > { %3258 = vst.msk [vmem:[%s5130_s12 + $0x30] sm:$0xff] %vm3251_vm13, %v3225_v24  ;;  %v3223_v22 = vsel %vm3158_vm8, %v3043_v14, %v3191_v21  ;;  %3272 = vst.msk [vmem:[%s5130_s12 + $0xa0] sm:$0xff] %vm3251_vm13, %v3239_v28  ;;  %vm3161_vm10 = vcmp.ge.f32.partialorder %v3054_v26, 0.0  ;;  %v3194_v31 = vmul.f32 %v5118_v37, %v3054_v26  ;;  %vm3177_vm11 = vcmp.ge.f32.partialorder %v3118_v27, 0.0 }
 0x1f4   : > { %3256 = vst.msk [vmem:[%s5130_s12 + $0x20] sm:$0xff] %vm3251_vm13, %v3223_v22  ;;  %v3210_v63 = vmul.f32 %v5118_v37, %v3118_v27  ;;  %vm3159_vm12 = vcmp.ge.f32.partialorder %v3046_v29, 0.0  ;;  %v3192_v32 = vmul.f32 %v5118_v37, %v3046_v29  ;;  %vm3175_vm14 = vcmp.ge.f32.partialorder %v3110_v30, 0.0 }
 0x1f5   : > { %v3208_v33 = vmul.f32 %v5118_v37, %v3110_v30  ;;  %v3226_v34 = vsel %vm3161_vm10, %v3054_v26, %v3194_v31 }
 0x1f6   : > { %v3242_v35 = vsel %vm3177_vm11, %v3118_v27, %v3210_v63  ;;  %3259 = vst.msk [vmem:[%s5130_s12 + $0x38] sm:$0xff] %vm3251_vm13, %v3226_v34  ;;  %v3224_v38 = vsel %vm3159_vm12, %v3046_v29, %v3192_v32 }
 0x1f7   : > { %3275 = vst.msk [vmem:[%s5130_s12 + $0xb8] sm:$0xff] %vm3251_vm13, %v3242_v35  ;;  %v3240_v39 = vsel %vm3175_vm14, %v3110_v30, %v3208_v33  ;;  %3257 = vst.msk [vmem:[%s5130_s12 + $0x28] sm:$0xff] %vm3251_vm13, %v3224_v38 }
 0x1f8   : > { %3273 = vst.msk [vmem:[%s5130_s12 + $0xa8] sm:$0xff] %vm3251_vm13, %v3240_v39 }
 0x22c   : > { %v3963_v40 = vpop.f32.mrb[8].mxu1 }
 0x22d   : > { %v3131_v41 = vadd.f32 %v3963_v40, %v5114_v36  ;;  %v3122_v42 = vpop.f32.mrb[9].mxu1  ;;  %v3947_v48 = vpop.f32.mrb[8].mxu0 }
 0x22e   : > { %v3123_v43 = vadd.f32 %v5114_v36, %v3122_v42  ;;  %v3964_v44 = vpop.f32.mrb[10].mxu1  ;;  %v3067_v51 = vadd.f32 %v3947_v48, %v5114_v36  ;;  %v3058_v53 = vpop.f32.mrb[9].mxu0 }
 0x22f   : > { %vm3180_vm15 = vcmp.ge.f32.partialorder %v3131_v41, 0.0  ;;  %v3213_v45 = vmul.f32 %v5118_v37, %v3131_v41  ;;  %v3134_v46 = vadd.f32 %v3964_v44, %v5114_v36  ;;  %v3125_v47 = vpop.f32.mrb[11].mxu1  ;;  %v3059_v55 = vadd.f32 %v5114_v36, %v3058_v53  ;;  %v3948_v57 = vpop.f32.mrb[10].mxu0 }
 0x230   : > { %vm3178_vm0 = vcmp.ge.f32.partialorder %v3123_v43, 0.0  ;;  %v3211_v49 = vmul.f32 %v5118_v37, %v3123_v43  ;;  %v3126_v50 = vadd.f32 %v5114_v36, %v3125_v47  ;;  %vm3164_vm3 = vcmp.ge.f32.partialorder %v3067_v51, 0.0  ;;  %v3061_v62 = vpop.f32.mrb[11].mxu0 }
 0x231   : > { %v3245_v52 = vsel %vm3180_vm15, %v3131_v41, %v3213_v45  ;;  %vm3181_vm1 = vcmp.ge.f32.partialorder %v3134_v46, 0.0  ;;  %v3214_v54 = vmul.f32 %v5118_v37, %v3134_v46  ;;  %v3197_v59 = vmul.f32 %v5118_v37, %v3067_v51 }
 0x232   : > { %3278 = vst.msk [vmem:[%s5130_s12 + $0xd0] sm:$0xff] %vm3251_vm13, %v3245_v52  ;;  %v3243_v56 = vsel %vm3178_vm0, %v3123_v43, %v3211_v49  ;;  %vm3179_vm2 = vcmp.ge.f32.partialorder %v3126_v50, 0.0  ;;  %v3212_v58 = vmul.f32 %v5118_v37, %v3126_v50  ;;  %v3070_v60 = vadd.f32 %v3948_v57, %v5114_v36 }
 0x233   : > { %3276 = vst.msk [vmem:[%s5130_s12 + $0xc0] sm:$0xff] %vm3251_vm13, %v3243_v56  ;;  %v3246_v61 = vsel %vm3181_vm1, %v3134_v46, %v3214_v54  ;;  %vm3162_vm4 = vcmp.ge.f32.partialorder %v3059_v55, 0.0  ;;  %v3195_v0 = vmul.f32 %v5118_v37, %v3059_v55  ;;  %v3062_v1 = vadd.f32 %v5114_v36, %v3061_v62 }
 0x234   : > { %3279 = vst.msk [vmem:[%s5130_s12 + $0xd8] sm:$0xff] %vm3251_vm13, %v3246_v61  ;;  %v3244_v2 = vsel %vm3179_vm2, %v3126_v50, %v3212_v58  ;;  %v3229_v3 = vsel %vm3164_vm3, %v3067_v51, %v3197_v59  ;;  %vm3165_vm5 = vcmp.ge.f32.partialorder %v3070_v60, 0.0  ;;  %v3198_v4 = vmul.f32 %v5118_v37, %v3070_v60 }
 0x235   : > { %3277 = vst.msk [vmem:[%s5130_s12 + $0xc8] sm:$0xff] %vm3251_vm13, %v3244_v2  ;;  %3262 = vst.msk [vmem:[%s5130_s12 + $0x50] sm:$0xff] %vm3251_vm13, %v3229_v3  ;;  %v3227_v5 = vsel %vm3162_vm4, %v3059_v55, %v3195_v0  ;;  %vm3163_vm6 = vcmp.ge.f32.partialorder %v3062_v1, 0.0  ;;  %v3196_v6 = vmul.f32 %v5118_v37, %v3062_v1 }
 0x236   : > { %3260 = vst.msk [vmem:[%s5130_s12 + $0x40] sm:$0xff] %vm3251_vm13, %v3227_v5  ;;  %v3230_v7 = vsel %vm3165_vm5, %v3070_v60, %v3198_v4 }
 0x237   : > { %3263 = vst.msk [vmem:[%s5130_s12 + $0x58] sm:$0xff] %vm3251_vm13, %v3230_v7  ;;  %v3228_v8 = vsel %vm3163_vm6, %v3062_v1, %v3196_v6 }
 0x238   : > { %3261 = vst.msk [vmem:[%s5130_s12 + $0x48] sm:$0xff] %vm3251_vm13, %v3228_v8 }
 0x268   : > { %v3967_v9 = vpop.f32.mrb[12].mxu1 }
 0x269   : > { %v3147_v10 = vadd.f32 %v3967_v9, %v5114_v36  ;;  %v3138_v12 = vpop.f32.mrb[13].mxu1  ;;  %v3951_v13 = vpop.f32.mrb[12].mxu0 }
 0x26a   : > { %v3139_v14 = vadd.f32 %v5114_v36, %v3138_v12  ;;  %v3968_v15 = vpop.f32.mrb[14].mxu1  ;;  %v3083_v16 = vadd.f32 %v3951_v13, %v5114_v36  ;;  %v3074_v11 = vpop.f32.mrb[13].mxu0 }
 0x26b   : > { %vm3184_vm7 = vcmp.ge.f32.partialorder %v3147_v10, 0.0  ;;  %v3217_v17 = vmul.f32 %v5118_v37, %v3147_v10  ;;  %v3150_v18 = vadd.f32 %v3968_v15, %v5114_v36  ;;  %v3141_v19 = vpop.f32.mrb[15].mxu1  ;;  %v3075_v20 = vadd.f32 %v5114_v36, %v3074_v11  ;;  %v3952_v23 = vpop.f32.mrb[14].mxu0 }
 0x26c   : > { %vm3182_vm8 = vcmp.ge.f32.partialorder %v3139_v14, 0.0  ;;  %v3215_v21 = vmul.f32 %v5118_v37, %v3139_v14  ;;  %v3142_v24 = vadd.f32 %v5114_v36, %v3141_v19  ;;  %vm3168_vm9 = vcmp.ge.f32.partialorder %v3083_v16, 0.0  ;;  %v3077_v22 = vpop.f32.mrb[15].mxu0 }
 0x26d   : > { %v3201_v25 = vmul.f32 %v5118_v37, %v3083_v16  ;;  %v3249_v26 = vsel %vm3184_vm7, %v3147_v10, %v3217_v17  ;;  %v3086_v27 = vadd.f32 %v3952_v23, %v5114_v36  ;;  %vm3166_vm10 = vcmp.ge.f32.partialorder %v3075_v20, 0.0 }
 0x26e   : > { %3282 = vst.msk [vmem:[%s5130_s12 + $0xf0] sm:$0xff] %vm3251_vm13, %v3249_v26  ;;  %v3199_v28 = vmul.f32 %v5118_v37, %v3075_v20  ;;  %v3247_v29 = vsel %vm3182_vm8, %v3139_v14, %v3215_v21  ;;  %vm3185_vm11 = vcmp.ge.f32.partialorder %v3150_v18, 0.0  ;;  %v3218_v63 = vmul.f32 %v5118_v37, %v3150_v18 }
 0x26f   : > { %v3233_v30 = vsel %vm3168_vm9, %v3083_v16, %v3201_v25  ;;  %3280 = vst.msk [vmem:[%s5130_s12 + $0xe0] sm:$0xff] %vm3251_vm13, %v3247_v29  ;;  %vm3169_vm12 = vcmp.ge.f32.partialorder %v3086_v27, 0.0  ;;  %v3202_v31 = vmul.f32 %v5118_v37, %v3086_v27  ;;  %v3078_v33 = vadd.f32 %v5114_v36, %v3077_v22 }
 0x270   : > { %3266 = vst.msk [vmem:[%s5130_s12 + $0x70] sm:$0xff] %vm3251_vm13, %v3233_v30  ;;  %v3231_v32 = vsel %vm3166_vm10, %v3075_v20, %v3199_v28  ;;  %vm3183_vm14 = vcmp.ge.f32.partialorder %v3142_v24, 0.0  ;;  %v3216_v34 = vmul.f32 %v5118_v37, %v3142_v24  ;;  %v3250_v38 = vsel %vm3185_vm11, %v3150_v18, %v3218_v63 }
 0x271   : > { %3264 = vst.msk [vmem:[%s5130_s12 + $0x60] sm:$0xff] %vm3251_vm13, %v3231_v32  ;;  %v3234_v35 = vsel %vm3169_vm12, %v3086_v27, %v3202_v31  ;;  %3283 = vst.msk [vmem:[%s5130_s12 + $0xf8] sm:$0xff] %vm3251_vm13, %v3250_v38  ;;  %vm3167_vm15 = vcmp.ge.f32.partialorder %v3078_v33, 0.0  ;;  %v3200_v39 = vmul.f32 %v5118_v37, %v3078_v33 }
 0x272   : > { %3267 = vst.msk [vmem:[%s5130_s12 + $0x78] sm:$0xff] %vm3251_vm13, %v3234_v35  ;;  %v3248_v40 = vsel %vm3183_vm14, %v3142_v24, %v3216_v34 }
 0x273   : > { %3281 = vst.msk [vmem:[%s5130_s12 + $0xe8] sm:$0xff] %vm3251_vm13, %v3248_v40  ;;  %v3232_v36 = vsel %vm3167_vm15, %v3078_v33, %v3200_v39 }
 0x274   : > { %3265 = vst.msk [vmem:[%s5130_s12 + $0x68] sm:$0xff] %vm3251_vm13, %v3232_v36 }
 0x275   : > { %4298 = shalt.err (!%p4295_p5)
}
 0x276   : > { %s4299_s5 = scalar_lea.hbm %s5251_s16, 4096  ;;  %s4303_s8 = scalar_lea.hbm %s5312_s4, 8192 }
 0x277   : > { %p4300_p6 = scmp.ne.s32.totalorder %s5251_s16, %s4299_s5  ;;  %p4304_p10 = scmp.lt.u32.totalorder %s5251_s16, %s5312_s4 }
 0x278   : > { %p4305_p11 = scmp.lt.u32.totalorder %s4303_s8, %s4299_s5  ;;  %p4307_p13 = scmp.lt.u32.totalorder %s4299_s5, %s5251_s16 }
 0x279   : > { %p4301_p7 = pnand %p4300_p6, %p4443_p4 }
 0x27a   : > { %p4306_p12 = por %p4305_p11, %p4304_p10 }
 0x27b   : > { %p4302_p9 = pneg %p4301_p7 }
 0x27c   : > { %p4308_p0 = por %p4307_p13, %p4306_p12 }
 0x27e   : > { %p4309_p1 = pnand %p4308_p0, %p4302_p9 }
 0x280   : > { %4312 = shalt.err (!%p4309_p1)
}
 0x281   : > { %s4374_s12 = smov 128  }
 0x282   : > { %3978 = dma.vmem_to_hbm [thread:$0]  (%p4443_p4), %s5255_s14, 4096, %s5251_s16, %s5261_s3, %s4374_s12, %s4374_s12, %s4366_s10  }
 0x283 PF: > { %p3984_p2 = scmp.ge.s32.totalorder %s4363_s22, 2  ;;  %s3316_s13 = sand.u32 1, %s4343_s17  }
 0x284   : > { %s3317_s20 = scalar_lea.sflag [#allocation5], %s3316_s13 }
 0x285   : > { %p3981_p3 = pnand %p3984_p2, %p4450_p8 }
 0x287   : > { %4338 = dma.done.wait (!%p3981_p3), %s3317_s20, 4096  }
 0x288   : > { %4340 = vsyncadd (!%p3981_p3), %s3317_s20, 4294963200  ;;  %s18_s22 = sadd.s32 1, %s4363_s22   ;;  %s5315_s17 = smov %s4347_s18 }
 0x289   : > { %p15_p5 = scmp.ge.s32.totalorder %s18_s22, 4   ;;  %s5316_s18 = smov %s4351_s19 }
 0x28a   : > { %s5317_s19 = smov %s4456_s29  ;;  %s5318_s20 = smov %s4359_s21 }
 0x28b   : > { %s5319_s21 = smov %s5321_s24  ;;  %17 = sbr.rel (!%p15_p5) target bundleno = 6 (0x6), region = 73 }
 0x292   :  { %3322 = vsyncpa [#allocation5], 1 }
 0x293   :  { %3324 = vsyncpa [#allocation5 + $0x1], 1 }

</bundles_post_ra>
